<compile_context>
chip_gen: v7x
topology: tpu7x:2x2x1
jax: 0.10.0
libtpu: 0.0.40
codegen_flags: <defaults>
</compile_context>

<pallas_src>
import jax
import jax.numpy as jnp
from jax import lax
from jax.experimental import pallas as pl
from jax.experimental.pallas import tpu as pltpu


_INV_SQRT2 = 0.7071067811865475   # exact (erf) GELU constant, matches nn.GELU default
_RES_SCALE = 1.0 / 1.414          # forward_fcnn uses the literal 1.414, not sqrt(2)
_BN_EPS = 1e-5
_LEAKY_SLOPE = 0.01               # PyTorch nn.LeakyReLU default
_LANE = 128


# ----------------------------------------------------------------------------- small helpers
def _round_up(n, m):
    return ((n + m - 1) // m) * m


def _pick_vmem_limit():
    """Per-generation VMEM budget (review item): ~3/4 of physical, capped at 100 MiB.
    v5e/v6e (128 MiB) -> 96 MiB, v7x (64 MiB) -> 48 MiB.  Conservative 48 MiB fallback."""
    try:
        cap = int(pltpu.get_tpu_info().vmem_capacity_bytes)
    except Exception:
        cap = 64 * 1024 * 1024
    return int(min((cap * 3) // 4, 100 * 1024 * 1024))


# ----------------------------------------------------------------------------- shared math
def _gelu(v):
    # TODO(synk): tanh-approx GELU would move work to the EUP slot; kept exact-erf for parity.
    return 0.5 * v * (1.0 + lax.erf(v * _INV_SQRT2))


def _leaky_relu(v):
    return jnp.where(v >= 0, v, _LEAKY_SLOPE * v)


def _bn_gelu(pre, gamma, beta):
    """BatchNorm1d (training-mode batch stats over axis 0) + exact GELU.

    One-pass statistics (sum / sum-of-squares) folded into a per-feature scale/shift.
    NOTE: one-pass variance can lose precision for very large B / large activations;
    fine at these shapes (see review correctness note).
    """
    n = pre.shape[0]
    inv_n = 1.0 / n
    s = jnp.sum(pre, axis=0, keepdims=True)
    ss = jnp.sum(pre * pre, axis=0, keepdims=True)
    mean = s * inv_n
    var = jnp.maximum(ss * inv_n - mean * mean, 0.0)
    scale = gamma * lax.rsqrt(var + _BN_EPS)
    shift = beta - mean * scale
    return _gelu(pre * scale + shift)


# ----------------------------------------------------------------------------- FCBlock kernel
def _fc_block_kernel(x_ref, w_ref, gamma_ref, beta_ref, o_ref):
    # x_ref:(B,K) VMEM-resident across N tiles; w_ref:(K,TN); gamma/beta:(1,TN); o_ref:(B,TN)
    # Linear bias intentionally omitted: BN mean subtraction cancels it exactly.
    pre = jnp.dot(x_ref[...], w_ref[...], preferred_element_type=jnp.float32)
    o_ref[...] = _bn_gelu(pre, gamma_ref[...], beta_ref[...]).astype(o_ref.dtype)


def fc_block(x, w, gamma, beta, *, tile_n=512):
    """FCBlock = Linear(no bias) -> BatchNorm1d(batch stats) -> GELU, tiled over out_feats.

    BN stats are per-feature, so tiling N is exact; the full batch B stays inside each tile.
    tile_n default raised to 512 (HBM-roofline) and auto-clamped to the per-chip VMEM budget.
    """
    # TODO(synk): if B ever exceeds VMEM, switch to a two-phase sum/sumsq accumulation over
    # B tiles (the single-pass BN stats here require the whole batch per grid step).
    B, K = x.shape
    N = w.shape[1]
    vmem_limit = _pick_vmem_limit()

    tile_n = max(_LANE, _round_up(tile_n, _LANE))
    tile_n = min(tile_n, _round_up(N, _LANE))

    # Keep x + double-buffered (weight, gamma, beta, out) tiles under ~half the VMEM budget.
    def _tile_bytes(tn):
        return 4 * (B * K + 2 * (K * tn + 2 * tn + B * tn))
    while tile_n > _LANE and _tile_bytes(tile_n) > vmem_limit // 2:
        tile_n -= _LANE

    n_pad = (-N) % tile_n
    if n_pad:
        w = jnp.pad(w, ((0, 0), (0, n_pad)))
        gamma = jnp.pad(gamma, ((0, n_pad),), constant_values=1.0)
        beta = jnp.pad(beta, ((0, n_pad),))
    Np = N + n_pad
    g2 = gamma.reshape(1, Np)
    b2 = beta.reshape(1, Np)

    cost = pl.CostEstimate(
        flops=int(2 * B * K * Np + 10 * B * Np),
        transcendentals=int(B * Np),                              # erf
        bytes_accessed=int(4 * (B * K + K * Np + 2 * Np + B * Np)))

    out = pl.pallas_call(
        _fc_block_kernel,
        out_shape=jax.ShapeDtypeStruct((B, Np), x.dtype),
        grid_spec=pltpu.PrefetchScalarGridSpec(
            num_scalar_prefetch=0,
            grid=(Np // tile_n,),
            in_specs=[
                pl.BlockSpec((B, K), lambda j: (0, 0)),          # x stays resident
                pl.BlockSpec((K, tile_n), lambda j: (0, j)),     # weight N-tile (double-buffered)
                pl.BlockSpec((1, tile_n), lambda j: (0, j)),
                pl.BlockSpec((1, tile_n), lambda j: (0, j)),
            ],
            out_specs=pl.BlockSpec((B, tile_n), lambda j: (0, j)),
        ),
        compiler_params=pltpu.CompilerParams(
            dimension_semantics=("parallel",),                   # shard N tiles across TCs (v7x)
            vmem_limit_bytes=vmem_limit),
        cost_estimate=cost,
    )(x, w, g2, b2)
    return out[:, :N] if n_pad else out


# ----------------------------------------------------------------------------- fused forward_fcnn
# vec-slab row layout (one lane-dense (16, Wv) slab -> single DMA)
_V_WT1, _V_BX1, _V_BX2, _V_BY1, _V_BY2, _V_BT2 = 0, 1, 2, 3, 4, 5
_V_W2T, _V_W3T = 6, 7
_V_G1, _V_BE1, _V_G2, _V_BE2, _V_G3, _V_BE3 = 8, 9, 10, 11, 12, 13
_V_W4T, _V_B4 = 14, 15
_N_VEC_ROWS = 16


def _make_fused_kernel(Dx, Dy, E, H, OUTP):
    def kernel(act_ref, vec_ref, wemb1_ref, wemb2_ref, w1_ref,
               w23h_ref, w23y_ref, w4h_ref, w4y_ref, o_ref):
        dot = lambda a, b: jnp.dot(a, b, preferred_element_type=jnp.float32)

        # ---- unpack the single lane-dense activation slab [x | y | t | cmask | pad] ----
        a = act_ref[...]
        x = a[:, :Dx]
        y = a[:, Dx:Dx + Dy]
        t = a[:, Dx + Dy:Dx + Dy + 1]
        m = a[:, Dx + Dy + 1:Dx + Dy + 2]

        # ---- unpack the one-row parameter slab (static sublane slices, zero DMA cost) ----
        v = vec_ref[...]
        wt1 = v[_V_WT1:_V_WT1 + 1, :E]
        bx1 = v[_V_BX1:_V_BX1 + 1, :E]
        bx2 = v[_V_BX2:_V_BX2 + 1, :E]
        by1 = v[_V_BY1:_V_BY1 + 1, :E]
        by2 = v[_V_BY2:_V_BY2 + 1, :E]
        bt2 = v[_V_BT2:_V_BT2 + 1, :E]
        w2t = v[_V_W2T:_V_W2T + 1, :H]
        w3t = v[_V_W3T:_V_W3T + 1, :H]
        g1 = v[_V_G1:_V_G1 + 1, :H]
        be1 = v[_V_BE1:_V_BE1 + 1, :H]
        g2 = v[_V_G2:_V_G2 + 1, :H]
        be2 = v[_V_BE2:_V_BE2 + 1, :H]
        g3 = v[_V_G3:_V_G3 + 1, :H]
        be3 = v[_V_BE3:_V_BE3 + 1, :H]
        w4t = v[_V_W4T:_V_W4T + 1, :OUTP]
        b4 = v[_V_B4:_V_B4 + 1, :OUTP]

        # ---- unpack host-side packed weight slabs ----
        wemb1 = wemb1_ref[...]                 # (Dx+Dy, E): wx1 | wy1
        wx1, wy1 = wemb1[:Dx], wemb1[Dx:]
        wemb2 = wemb2_ref[...]                 # (3E, E): wx2 | wy2 | wt2
        wx2, wy2, wt2 = wemb2[:E], wemb2[E:2 * E], wemb2[2 * E:]
        w23h = w23h_ref[...]                   # (2H, H): w2h | w3h
        w2h, w3h = w23h[:H], w23h[H:]
        w23y = w23y_ref[...]                   # (2Dy, H): w2y | w3y
        w2y, w3y = w23y[:Dy], w23y[Dy:]

        # --- embeddings: x_embed_nn / y_embed_nn (Linear->LeakyReLU->Linear), TimeSiren ---
        x_e = dot(_leaky_relu(dot(x, wx1) + bx1), wx2) + bx2
        y_e = dot(_leaky_relu(dot(y, wy1) + by1), wy2) + by2
        t_e = dot(jnp.sin(t * wt1), wt2) + bt2     # lin1 has fan_in=1 -> broadcast multiply

        # context mask:  x_e = x_e * (-1 * (1 - context_mask)), mask broadcast over features
        x_e = x_e * (-(1.0 - m))

        r = jnp.float32(_RES_SCALE)

        # fc1 : FCBlock(cat(x_e, y_e, t_e)) — single K=3E matmul (one MXU push)
        h0 = jnp.concatenate([x_e, y_e, t_e], axis=1)          # (B, 3E), 3E <= 128 lanes
        h1 = _bn_gelu(dot(h0, w1_ref[...]), g1, be1)

        # fc2 : FCBlock(cat(h1/1.414, y, t)) + h1/1.414  (concat as split-weight matmuls)
        h1r = h1 * r
        h2 = _bn_gelu(dot(h1r, w2h) + dot(y, w2y) + t * w2t, g2, be2) + h1r

        # fc3 : FCBlock(cat(h2/1.414, y, t)) + h2/1.414
        h2r = h2 * r
        h3 = _bn_gelu(dot(h2r, w3h) + dot(y, w3y) + t * w3t, g3, be3) + h2r

        # fc4 : plain Linear(cat(h3, y, t)) — bias kept, no BN follows
        out = dot(h3, w4h_ref[...]) + dot(y, w4y_ref[...]) + t * w4t + b4
        o_ref[...] = out.astype(o_ref.dtype)

    return kernel


def pack_fused_params(params, out_dim):
    """Host-side packing of the many tiny parameter arrays into a few lane-dense slabs
    (review item: cuts ~16 one-row DMAs to 1 and 9 weight DMAs vs 34 inputs before)."""
    E = params["wx2"].shape[0]
    H = params["w2h"].shape[0]
    Dx = params["wx1"].shape[0]
    Dy = params["wy1"].shape[0]
    out_p = _round_up(out_dim, _LANE)
    Wv = _round_up(max(E, H, out_p), _LANE)

    def row(v):
        v = jnp.asarray(v, jnp.float32).reshape(-1)
        return jnp.pad(v, (0, Wv - v.shape[0]))

    vec_rows = [None] * _N_VEC_ROWS
    vec_rows[_V_WT1] = row(params["wt1"])
    vec_rows[_V_BX1] = row(params["bx1"])
    vec_rows[_V_BX2] = row(params["bx2"])
    vec_rows[_V_BY1] = row(params["by1"])
    vec_rows[_V_BY2] = row(params["by2"])
    vec_rows[_V_BT2] = row(params["bt2"])
    vec_rows[_V_W2T] = row(params["w2t"])
    vec_rows[_V_W3T] = row(params["w3t"])
    vec_rows[_V_G1] = row(params["g1"])
    vec_rows[_V_BE1] = row(params["be1"])
    vec_rows[_V_G2] = row(params["g2"])
    vec_rows[_V_BE2] = row(params["be2"])
    vec_rows[_V_G3] = row(params["g3"])
    vec_rows[_V_BE3] = row(params["be3"])
    vec_rows[_V_W4T] = row(params["w4t"])
    vec_rows[_V_B4] = row(params["b4"])
    vecs = jnp.stack(vec_rows, axis=0)                                  # (16, Wv)

    packed = {
        "vecs": vecs,
        "wemb1": jnp.concatenate([params["wx1"], params["wy1"]], axis=0),        # (Dx+Dy, E)
        "wemb2": jnp.concatenate([params["wx2"], params["wy2"], params["wt2"]], axis=0),  # (3E, E)
        "w1": jnp.concatenate([params["w1x"], params["w1y"], params["w1t"]], axis=0),     # (3E, H)
        "w23h": jnp.concatenate([params["w2h"], params["w3h"]], axis=0),          # (2H, H)
        "w23y": jnp.concatenate([params["w2y"], params["w3y"]], axis=0),          # (2Dy, H)
        "w4h": jnp.pad(params["w4h"], ((0, 0), (0, out_p - out_dim))),            # (H, out_p)
        "w4y": jnp.pad(params["w4y"], ((0, 0), (0, out_p - out_dim))),            # (Dy, out_p)
        "dims": (Dx, Dy, E, H, out_p, out_dim),
    }
    return packed


def fused_fcnn_forward(packed, x, y, t, cmask):
    """Entire forward_fcnn (embeddings + fc1..fc4 + residuals) in one pallas_call.

    grid=(1,) is deliberate: the layer chain is serially dependent and every intermediate
    stays in VMEM.
    """
    # TODO(synk): as H grows, overlap the HxH weight DMAs with the embedding/fc1 compute
    # (memory_space=pl.ANY + make_async_copy prefetch); at H=128 the exposed DMA is noise.
    # TODO(synk): on v7x, stack >=2 independent forward problems and add a leading
    # "parallel" grid axis to use both TensorCores; single problem -> single TC is fine.
    # TODO(synk): opt-in bf16 weights would halve weight HBM traffic; kept f32 for parity.
    Dx, Dy, E, H, out_p, out_dim = packed["dims"]
    B = x.shape[0]

    # Pack the narrow activations x|y|t|cmask into one lane-dense (B, 128) slab (one DMA).
    act = jnp.concatenate([x, y, t, cmask], axis=1).astype(jnp.float32)
    w_act = _round_up(act.shape[1], _LANE)
    act = jnp.pad(act, ((0, 0), (0, w_act - act.shape[1])))

    inputs = [act, packed["vecs"], packed["wemb1"], packed["wemb2"], packed["w1"],
              packed["w23h"], packed["w23y"], packed["w4h"], packed["w4y"]]
    in_specs = [pl.BlockSpec(a.shape, lambda i: (0, 0)) for a in inputs]

    flops = 2 * B * (Dx * E + Dy * E + 3 * E * E + 3 * E * H
                     + 2 * (H * H + Dy * H) + (H + Dy) * out_p) + 30 * B * H
    cost = pl.CostEstimate(
        flops=int(flops),
        transcendentals=int(B * (3 * H + E)),          # erf per FCBlock + sin in TimeSiren
        bytes_accessed=int(4 * (sum(int(a.size) for a in inputs) + B * out_p)))

    kernel = _make_fused_kernel(Dx, Dy, E, H, out_p)

    out = pl.pallas_call(
        kernel,
        out_shape=jax.ShapeDtypeStruct((B, out_p), jnp.float32),
        grid_spec=pltpu.PrefetchScalarGridSpec(
            num_scalar_prefetch=0,
            grid=(1,),
            in_specs=in_specs,
            out_specs=pl.BlockSpec((B, out_p), lambda i: (0, 0)),
        ),
        compiler_params=pltpu.CompilerParams(
            dimension_semantics=("arbitrary",),
            vmem_limit_bytes=_pick_vmem_limit()),
        cost_estimate=cost,
    )(*inputs)
    return out[:, :out_dim] if out_p != out_dim else out


# ----------------------------------------------------------------------------- params & references
def _dense(key, fan_in, fan_out):
    return jax.random.normal(key, (fan_in, fan_out), jnp.float32) / jnp.sqrt(jnp.float32(fan_in))


def init_params(key, x_dim, y_dim, embed_dim, n_hidden, output_dim):
    E, H = embed_dim, n_hidden
    keys = iter(jax.random.split(key, 48))
    nk = lambda: next(keys)
    small = lambda shape: 0.1 * jax.random.normal(nk(), shape, jnp.float32)
    p = {}
    # x_embed_nn / y_embed_nn : Linear -> LeakyReLU -> Linear
    p["wx1"], p["bx1"] = _dense(nk(), x_dim, E), small((1, E))
    p["wx2"], p["bx2"] = _dense(nk(), E, E), small((1, E))
    p["wy1"], p["by1"] = _dense(nk(), y_dim, E), small((1, E))
    p["wy2"], p["by2"] = _dense(nk(), E, E), small((1, E))
    # t_embed_nn (TimeSiren): lin1 (no bias) -> sin -> lin2
    p["wt1"] = _dense(nk(), 1, E)
    p["wt2"], p["bt2"] = _dense(nk(), E, E), small((1, E))
    # fc1 = FCBlock(3E, H): weight split over the [x_e | y_e | t_e] row blocks
    p["w1x"], p["w1y"], p["w1t"] = _dense(nk(), E, H), _dense(nk(), E, H), _dense(nk(), E, H)
    p["b1"] = small((1, H))                                   # reference only; cancelled by BN
    p["g1"], p["be1"] = 1.0 + small((1, H)), small((1, H))
    # fc2 / fc3 = FCBlock(H + y_dim + 1, H): weight split over [h | y | t] row blocks
    for i in (2, 3):
        p[f"w{i}h"] = _dense(nk(), H, H)
        p[f"w{i}y"] = _dense(nk(), y_dim, H)
        p[f"w{i}t"] = _dense(nk(), 1, H)
        p[f"b{i}"] = small((1, H))                            # reference only; cancelled by BN
        p[f"g{i}"], p[f"be{i}"] = 1.0 + small((1, H)), small((1, H))
    # fc4 = Linear(H + y_dim + 1, output_dim), bias kept (no BN after it)
    p["w4h"] = _dense(nk(), H, output_dim)
    p["w4y"] = _dense(nk(), y_dim, output_dim)
    p["w4t"] = _dense(nk(), 1, output_dim)
    p["b4"] = small((1, output_dim))
    return p


def _ref_bn(v, g, b):
    mean = jnp.mean(v, axis=0, keepdims=True)
    var = jnp.mean((v - mean) ** 2, axis=0, keepdims=True)
    return (v - mean) / jnp.sqrt(var + _BN_EPS) * g + b


def _ref_gelu(v):
    return 0.5 * v * (1.0 + lax.erf(v / jnp.sqrt(2.0)))


def _ref_fc_block(x, w, b, gamma, beta):
    return _ref_gelu(_ref_bn(x @ w + b, gamma, beta))


def _ref_forward(p, x, y, t, cmask):
    leaky = lambda v: jnp.where(v >= 0, v, _LEAKY_SLOPE * v)
    x_e = leaky(x @ p["wx1"] + p["bx1"]) @ p["wx2"] + p["bx2"]
    y_e = leaky(y @ p["wy1"] + p["by1"]) @ p["wy2"] + p["by2"]
    t_e = jnp.sin(t @ p["wt1"]) @ p["wt2"] + p["bt2"]
    x_e = x_e * (-(1.0 - cmask))

    w1 = jnp.concatenate([p["w1x"], p["w1y"], p["w1t"]], axis=0)
    nn1 = _ref_gelu(_ref_bn(jnp.concatenate([x_e, y_e, t_e], axis=1) @ w1 + p["b1"],
                            p["g1"], p["be1"]))
    w2 = jnp.concatenate([p["w2h"], p["w2y"], p["w2t"]], axis=0)
    nn2 = _ref_gelu(_ref_bn(jnp.concatenate([nn1 / 1.414, y, t], axis=1) @ w2 + p["b2"],
                            p["g2"], p["be2"])) + nn1 / 1.414
    w3 = jnp.concatenate([p["w3h"], p["w3y"], p["w3t"]], axis=0)
    nn3 = _ref_gelu(_ref_bn(jnp.concatenate([nn2 / 1.414, y, t], axis=1) @ w3 + p["b3"],
                            p["g3"], p["be3"])) + nn2 / 1.414
    w4 = jnp.concatenate([p["w4h"], p["w4y"], p["w4t"]], axis=0)
    return jnp.concatenate([nn3, y, t], axis=1) @ w4 + p["b4"]


# ----------------------------------------------------------------------------- demo / self-test
if __name__ == "__main__":
    key = jax.random.PRNGKey(0)
    k_model, k_x, k_y, k_t, k_m, k_fb = jax.random.split(key, 6)

    # Small shapes consistent with the net_type='fc', use_prev=False path.
    B, x_dim, y_dim, embed_dim, n_hidden = 8, 16, 8, 32, 128
    output_dim = y_dim

    params = init_params(k_model, x_dim, y_dim, embed_dim, n_hidden, output_dim)
    x = jax.random.normal(k_x, (B, x_dim), jnp.float32)
    y = jax.random.normal(k_y, (B, y_dim), jnp.float32)
    t = jax.random.uniform(k_t, (B, 1), jnp.float32)
    cmask = jax.random.bernoulli(k_m, 0.5, (B, 1)).astype(jnp.float32)

    # (1) fully fused forward_fcnn (packed parameter slabs, packed activation slab)
    packed = pack_fused_params(params, output_dim)
    out = fused_fcnn_forward(packed, x, y, t, cmask)
    jax.block_until_ready(out)
    ref = _ref_forward(params, x, y, t, cmask)
    assert out.shape == (B, output_dim)
    assert jnp.allclose(out, ref, atol=1e-3, rtol=1e-3), (
        f"fused forward mismatch: max|diff|={float(jnp.max(jnp.abs(out - ref)))}")

    # (2) standalone tiled FCBlock (512-wide lane-dense N tiles, 'parallel' grid axis)
    kf1, kf2, kf3, kf4, kf5 = jax.random.split(k_fb, 5)
    in_feats, out_feats = 3 * embed_dim, 1024
    xb = jax.random.normal(kf1, (B, in_feats), jnp.float32)
    wb = _dense(kf2, in_feats, out_feats)
    bb = 0.1 * jax.random.normal(kf3, (out_feats,), jnp.float32)   # dropped in kernel (BN cancels it)
    gb = 1.0 + 0.1 * jax.random.normal(kf4, (out_feats,), jnp.float32)
    beb = 0.1 * jax.random.normal(kf5, (out_feats,), jnp.float32)

    ob = fc_block(xb, wb, gb, beb)
    jax.block_until_ready(ob)
    rb = _ref_fc_block(xb, wb, bb, gb, beb)
    assert jnp.allclose(ob, rb, atol=1e-3, rtol=1e-3), (
        f"fc_block mismatch: max|diff|={float(jnp.max(jnp.abs(ob - rb)))}")

    print("KERNEL_OK")
</pallas_src>

<mosaic_0001>
module attributes {stable_mosaic.version = 11 : i64} {
  func.func @kernel(%arg0: i32, %arg1: memref<8x128xf32, #tpu.memory_space<vmem>>, %arg2: memref<16x128xf32, #tpu.memory_space<vmem>>, %arg3: memref<24x32xf32, #tpu.memory_space<vmem>>, %arg4: memref<96x32xf32, #tpu.memory_space<vmem>>, %arg5: memref<96x128xf32, #tpu.memory_space<vmem>>, %arg6: memref<256x128xf32, #tpu.memory_space<vmem>>, %arg7: memref<16x128xf32, #tpu.memory_space<vmem>>, %arg8: memref<128x128xf32, #tpu.memory_space<vmem>>, %arg9: memref<8x128xf32, #tpu.memory_space<vmem>>, %arg10: memref<8x128xf32, #tpu.memory_space<vmem>>) attributes {dimension_semantics = [#tpu.dimension_semantics<arbitrary>], iteration_bounds = array<i64: 1>, scalar_prefetch = 0 : i64, scratch_operands = 0 : i64, tpu.core_type = #tpu.core_type<tc>, window_params = [{pipeline_mode = #tpu.pipeline_mode<synchronous>, transform_indices = @transform_0, window_bounds = array<i64: 8, 128>}, {pipeline_mode = #tpu.pipeline_mode<synchronous>, transform_indices = @transform_1, window_bounds = array<i64: 16, 128>}, {pipeline_mode = #tpu.pipeline_mode<synchronous>, transform_indices = @transform_2, window_bounds = array<i64: 24, 32>}, {pipeline_mode = #tpu.pipeline_mode<synchronous>, transform_indices = @transform_3, window_bounds = array<i64: 96, 32>}, {pipeline_mode = #tpu.pipeline_mode<synchronous>, transform_indices = @transform_4, window_bounds = array<i64: 96, 128>}, {pipeline_mode = #tpu.pipeline_mode<synchronous>, transform_indices = @transform_5, window_bounds = array<i64: 256, 128>}, {pipeline_mode = #tpu.pipeline_mode<synchronous>, transform_indices = @transform_6, window_bounds = array<i64: 16, 128>}, {pipeline_mode = #tpu.pipeline_mode<synchronous>, transform_indices = @transform_7, window_bounds = array<i64: 128, 128>}, {pipeline_mode = #tpu.pipeline_mode<synchronous>, transform_indices = @transform_8, window_bounds = array<i64: 8, 128>}, {pipeline_mode = #tpu.pipeline_mode<synchronous>, transform_indices = @transform_9, window_bounds = array<i64: 8, 128>}]} {
    %c0 = arith.constant 0 : index
    %c0_0 = arith.constant 0 : index
    %0 = vector.load %arg1[%c0, %c0_0] : memref<8x128xf32, #tpu.memory_space<vmem>>, vector<8x128xf32>
    %1 = vector.extract_strided_slice %0 {offsets = [0, 0], sizes = [8, 16], strides = [1, 1]} : vector<8x128xf32> to vector<8x16xf32>
    %2 = vector.extract_strided_slice %0 {offsets = [0, 16], sizes = [8, 8], strides = [1, 1]} : vector<8x128xf32> to vector<8x8xf32>
    %3 = vector.extract_strided_slice %0 {offsets = [0, 24], sizes = [8, 1], strides = [1, 1]} : vector<8x128xf32> to vector<8x1xf32>
    %4 = vector.extract_strided_slice %0 {offsets = [0, 25], sizes = [8, 1], strides = [1, 1]} : vector<8x128xf32> to vector<8x1xf32>
    %c0_1 = arith.constant 0 : index
    %c0_2 = arith.constant 0 : index
    %5 = vector.load %arg2[%c0_1, %c0_2] : memref<16x128xf32, #tpu.memory_space<vmem>>, vector<16x128xf32>
    %6 = vector.extract_strided_slice %5 {offsets = [0, 0], sizes = [1, 32], strides = [1, 1]} : vector<16x128xf32> to vector<1x32xf32>
    %7 = vector.extract_strided_slice %5 {offsets = [1, 0], sizes = [1, 32], strides = [1, 1]} : vector<16x128xf32> to vector<1x32xf32>
    %8 = vector.extract_strided_slice %5 {offsets = [2, 0], sizes = [1, 32], strides = [1, 1]} : vector<16x128xf32> to vector<1x32xf32>
    %9 = vector.extract_strided_slice %5 {offsets = [3, 0], sizes = [1, 32], strides = [1, 1]} : vector<16x128xf32> to vector<1x32xf32>
    %10 = vector.extract_strided_slice %5 {offsets = [4, 0], sizes = [1, 32], strides = [1, 1]} : vector<16x128xf32> to vector<1x32xf32>
    %11 = vector.extract_strided_slice %5 {offsets = [5, 0], sizes = [1, 32], strides = [1, 1]} : vector<16x128xf32> to vector<1x32xf32>
    %12 = vector.extract_strided_slice %5 {offsets = [6, 0], sizes = [1, 128], strides = [1, 1]} : vector<16x128xf32> to vector<1x128xf32>
    %13 = vector.extract_strided_slice %5 {offsets = [7, 0], sizes = [1, 128], strides = [1, 1]} : vector<16x128xf32> to vector<1x128xf32>
    %14 = vector.extract_strided_slice %5 {offsets = [8, 0], sizes = [1, 128], strides = [1, 1]} : vector<16x128xf32> to vector<1x128xf32>
    %15 = vector.extract_strided_slice %5 {offsets = [9, 0], sizes = [1, 128], strides = [1, 1]} : vector<16x128xf32> to vector<1x128xf32>
    %16 = vector.extract_strided_slice %5 {offsets = [10, 0], sizes = [1, 128], strides = [1, 1]} : vector<16x128xf32> to vector<1x128xf32>
    %17 = vector.extract_strided_slice %5 {offsets = [11, 0], sizes = [1, 128], strides = [1, 1]} : vector<16x128xf32> to vector<1x128xf32>
    %18 = vector.extract_strided_slice %5 {offsets = [12, 0], sizes = [1, 128], strides = [1, 1]} : vector<16x128xf32> to vector<1x128xf32>
    %19 = vector.extract_strided_slice %5 {offsets = [13, 0], sizes = [1, 128], strides = [1, 1]} : vector<16x128xf32> to vector<1x128xf32>
    %20 = vector.extract_strided_slice %5 {offsets = [14, 0], sizes = [1, 128], strides = [1, 1]} : vector<16x128xf32> to vector<1x128xf32>
    %21 = vector.extract_strided_slice %5 {offsets = [15, 0], sizes = [1, 128], strides = [1, 1]} : vector<16x128xf32> to vector<1x128xf32>
    %c0_3 = arith.constant 0 : index
    %c0_4 = arith.constant 0 : index
    %22 = vector.load %arg3[%c0_3, %c0_4] : memref<24x32xf32, #tpu.memory_space<vmem>>, vector<24x32xf32>
    %23 = vector.extract_strided_slice %22 {offsets = [0, 0], sizes = [16, 32], strides = [1, 1]} : vector<24x32xf32> to vector<16x32xf32>
    %24 = vector.extract_strided_slice %22 {offsets = [16, 0], sizes = [8, 32], strides = [1, 1]} : vector<24x32xf32> to vector<8x32xf32>
    %c0_5 = arith.constant 0 : index
    %c0_6 = arith.constant 0 : index
    %25 = vector.load %arg4[%c0_5, %c0_6] : memref<96x32xf32, #tpu.memory_space<vmem>>, vector<96x32xf32>
    %26 = vector.extract_strided_slice %25 {offsets = [0, 0], sizes = [32, 32], strides = [1, 1]} : vector<96x32xf32> to vector<32x32xf32>
    %27 = vector.extract_strided_slice %25 {offsets = [32, 0], sizes = [32, 32], strides = [1, 1]} : vector<96x32xf32> to vector<32x32xf32>
    %28 = vector.extract_strided_slice %25 {offsets = [64, 0], sizes = [32, 32], strides = [1, 1]} : vector<96x32xf32> to vector<32x32xf32>
    %c0_7 = arith.constant 0 : index
    %c0_8 = arith.constant 0 : index
    %29 = vector.load %arg6[%c0_7, %c0_8] : memref<256x128xf32, #tpu.memory_space<vmem>>, vector<256x128xf32>
    %30 = vector.extract_strided_slice %29 {offsets = [0, 0], sizes = [128, 128], strides = [1, 1]} : vector<256x128xf32> to vector<128x128xf32>
    %31 = vector.extract_strided_slice %29 {offsets = [128, 0], sizes = [128, 128], strides = [1, 1]} : vector<256x128xf32> to vector<128x128xf32>
    %c0_9 = arith.constant 0 : index
    %c0_10 = arith.constant 0 : index
    %32 = vector.load %arg7[%c0_9, %c0_10] : memref<16x128xf32, #tpu.memory_space<vmem>>, vector<16x128xf32>
    %33 = vector.extract_strided_slice %32 {offsets = [0, 0], sizes = [8, 128], strides = [1, 1]} : vector<16x128xf32> to vector<8x128xf32>
    %34 = vector.extract_strided_slice %32 {offsets = [8, 0], sizes = [8, 128], strides = [1, 1]} : vector<16x128xf32> to vector<8x128xf32>
    %cst = arith.constant dense<0.000000e+00> : vector<8x32xf32>
    %35 = tpu.matmul %1, %23, %cst {dimension_numbers = #tpu.dot_dimension_numbers<[1], [0], [0], [1], [0, 0, 1, 1], [], []>} : vector<8x16xf32>, vector<16x32xf32>, vector<8x32xf32> -> vector<8x32xf32>
    %36 = vector.broadcast %7 : vector<1x32xf32> to vector<8x32xf32>
    %37 = arith.addf %35, %36 : vector<8x32xf32>
    %cst_11 = arith.constant 0.000000e+00 : f32
    %38 = vector.broadcast %cst_11 : f32 to vector<8x32xf32>
    %39 = arith.cmpf oge, %37, %38 : vector<8x32xf32>
    %cst_12 = arith.constant 0.00999999977 : f32
    %40 = vector.broadcast %cst_12 : f32 to vector<8x32xf32>
    %41 = arith.mulf %40, %37 : vector<8x32xf32>
    %42 = arith.select %39, %37, %41 : vector<8x32xi1>, vector<8x32xf32>
    %cst_13 = arith.constant dense<0.000000e+00> : vector<8x32xf32>
    %43 = tpu.matmul %42, %26, %cst_13 {dimension_numbers = #tpu.dot_dimension_numbers<[1], [0], [0], [1], [0, 0, 1, 1], [], []>} : vector<8x32xf32>, vector<32x32xf32>, vector<8x32xf32> -> vector<8x32xf32>
    %44 = vector.broadcast %8 : vector<1x32xf32> to vector<8x32xf32>
    %45 = arith.addf %43, %44 : vector<8x32xf32>
    %cst_14 = arith.constant dense<0.000000e+00> : vector<8x32xf32>
    %46 = tpu.matmul %2, %24, %cst_14 {dimension_numbers = #tpu.dot_dimension_numbers<[1], [0], [0], [1], [0, 0, 1, 1], [], []>} : vector<8x8xf32>, vector<8x32xf32>, vector<8x32xf32> -> vector<8x32xf32>
    %47 = vector.broadcast %9 : vector<1x32xf32> to vector<8x32xf32>
    %48 = arith.addf %46, %47 : vector<8x32xf32>
    %cst_15 = arith.constant 0.000000e+00 : f32
    %49 = vector.broadcast %cst_15 : f32 to vector<8x32xf32>
    %50 = arith.cmpf oge, %48, %49 : vector<8x32xf32>
    %cst_16 = arith.constant 0.00999999977 : f32
    %51 = vector.broadcast %cst_16 : f32 to vector<8x32xf32>
    %52 = arith.mulf %51, %48 : vector<8x32xf32>
    %53 = arith.select %50, %48, %52 : vector<8x32xi1>, vector<8x32xf32>
    %cst_17 = arith.constant dense<0.000000e+00> : vector<8x32xf32>
    %54 = tpu.matmul %53, %27, %cst_17 {dimension_numbers = #tpu.dot_dimension_numbers<[1], [0], [0], [1], [0, 0, 1, 1], [], []>} : vector<8x32xf32>, vector<32x32xf32>, vector<8x32xf32> -> vector<8x32xf32>
    %55 = vector.broadcast %10 : vector<1x32xf32> to vector<8x32xf32>
    %56 = arith.addf %54, %55 : vector<8x32xf32>
    %57 = vector.broadcast %3 : vector<8x1xf32> to vector<8x32xf32>
    %58 = vector.broadcast %6 : vector<1x32xf32> to vector<8x32xf32>
    %59 = arith.mulf %57, %58 : vector<8x32xf32>
    %60 = math.sin %59 : vector<8x32xf32>
    %cst_18 = arith.constant dense<0.000000e+00> : vector<8x32xf32>
    %61 = tpu.matmul %60, %28, %cst_18 {dimension_numbers = #tpu.dot_dimension_numbers<[1], [0], [0], [1], [0, 0, 1, 1], [], []>} : vector<8x32xf32>, vector<32x32xf32>, vector<8x32xf32> -> vector<8x32xf32>
    %62 = vector.broadcast %11 : vector<1x32xf32> to vector<8x32xf32>
    %63 = arith.addf %61, %62 : vector<8x32xf32>
    %cst_19 = arith.constant 1.000000e+00 : f32
    %64 = vector.broadcast %cst_19 : f32 to vector<8x1xf32>
    %65 = arith.subf %64, %4 : vector<8x1xf32>
    %cst_20 = arith.constant 0.000000e+00 : f32
    %66 = vector.broadcast %cst_20 : f32 to vector<8x1xf32>
    %67 = arith.subf %66, %65 : vector<8x1xf32>
    %68 = vector.broadcast %67 : vector<8x1xf32> to vector<8x32xf32>
    %69 = arith.mulf %45, %68 : vector<8x32xf32>
    %70 = tpu.concatenate %69, %56, %63 in 1 : vector<8x32xf32>, vector<8x32xf32>, vector<8x32xf32> -> vector<8x96xf32>
    %c0_21 = arith.constant 0 : index
    %c0_22 = arith.constant 0 : index
    %71 = vector.load %arg5[%c0_21, %c0_22] : memref<96x128xf32, #tpu.memory_space<vmem>>, vector<96x128xf32>
    %cst_23 = arith.constant dense<0.000000e+00> : vector<8x128xf32>
    %72 = tpu.matmul %70, %71, %cst_23 {dimension_numbers = #tpu.dot_dimension_numbers<[1], [0], [0], [1], [0, 0, 1, 1], [], []>} : vector<8x96xf32>, vector<96x128xf32>, vector<8x128xf32> -> vector<8x128xf32>
    %cst_24 = arith.constant dense<0.000000e+00> : vector<128xf32>
    %73 = vector.multi_reduction <add>, %72, %cst_24 [0] : vector<8x128xf32> to vector<128xf32>
    %74 = vector.shape_cast %73 : vector<128xf32> to vector<1x128xf32>
    %75 = arith.mulf %72, %72 : vector<8x128xf32>
    %cst_25 = arith.constant dense<0.000000e+00> : vector<128xf32>
    %76 = vector.multi_reduction <add>, %75, %cst_25 [0] : vector<8x128xf32> to vector<128xf32>
    %77 = vector.shape_cast %76 : vector<128xf32> to vector<1x128xf32>
    %cst_26 = arith.constant 1.250000e-01 : f32
    %78 = vector.broadcast %cst_26 : f32 to vector<1x128xf32>
    %79 = arith.mulf %74, %78 : vector<1x128xf32>
    %cst_27 = arith.constant 1.250000e-01 : f32
    %80 = vector.broadcast %cst_27 : f32 to vector<1x128xf32>
    %81 = arith.mulf %77, %80 : vector<1x128xf32>
    %82 = arith.mulf %79, %79 : vector<1x128xf32>
    %83 = arith.subf %81, %82 : vector<1x128xf32>
    %cst_28 = arith.constant 0.000000e+00 : f32
    %84 = vector.broadcast %cst_28 : f32 to vector<1x128xf32>
    %85 = arith.maximumf %83, %84 : vector<1x128xf32>
    %cst_29 = arith.constant 9.99999974E-6 : f32
    %86 = vector.broadcast %cst_29 : f32 to vector<1x128xf32>
    %87 = arith.addf %85, %86 : vector<1x128xf32>
    %88 = math.rsqrt %87 : vector<1x128xf32>
    %89 = arith.mulf %14, %88 : vector<1x128xf32>
    %90 = arith.mulf %79, %89 : vector<1x128xf32>
    %91 = arith.subf %15, %90 : vector<1x128xf32>
    %92 = vector.broadcast %89 : vector<1x128xf32> to vector<8x128xf32>
    %93 = arith.mulf %72, %92 : vector<8x128xf32>
    %94 = vector.broadcast %91 : vector<1x128xf32> to vector<8x128xf32>
    %95 = arith.addf %93, %94 : vector<8x128xf32>
    %cst_30 = arith.constant 5.000000e-01 : f32
    %96 = vector.broadcast %cst_30 : f32 to vector<8x128xf32>
    %97 = arith.mulf %96, %95 : vector<8x128xf32>
    %cst_31 = arith.constant 0.707106769 : f32
    %98 = vector.broadcast %cst_31 : f32 to vector<8x128xf32>
    %99 = arith.mulf %95, %98 : vector<8x128xf32>
    %100 = math.erf %99 : vector<8x128xf32>
    %cst_32 = arith.constant 1.000000e+00 : f32
    %101 = vector.broadcast %cst_32 : f32 to vector<8x128xf32>
    %102 = arith.addf %101, %100 : vector<8x128xf32>
    %103 = arith.mulf %97, %102 : vector<8x128xf32>
    %cst_33 = arith.constant 0.70721358 : f32
    %104 = vector.broadcast %cst_33 : f32 to vector<8x128xf32>
    %105 = arith.mulf %103, %104 : vector<8x128xf32>
    %cst_34 = arith.constant dense<0.000000e+00> : vector<8x128xf32>
    %106 = tpu.matmul %105, %30, %cst_34 {dimension_numbers = #tpu.dot_dimension_numbers<[1], [0], [0], [1], [0, 0, 1, 1], [], []>} : vector<8x128xf32>, vector<128x128xf32>, vector<8x128xf32> -> vector<8x128xf32>
    %cst_35 = arith.constant dense<0.000000e+00> : vector<8x128xf32>
    %107 = tpu.matmul %2, %33, %cst_35 {dimension_numbers = #tpu.dot_dimension_numbers<[1], [0], [0], [1], [0, 0, 1, 1], [], []>} : vector<8x8xf32>, vector<8x128xf32>, vector<8x128xf32> -> vector<8x128xf32>
    %108 = arith.addf %106, %107 : vector<8x128xf32>
    %109 = vector.broadcast %3 : vector<8x1xf32> to vector<8x128xf32>
    %110 = vector.broadcast %12 : vector<1x128xf32> to vector<8x128xf32>
    %111 = arith.mulf %109, %110 : vector<8x128xf32>
    %112 = arith.addf %108, %111 : vector<8x128xf32>
    %cst_36 = arith.constant dense<0.000000e+00> : vector<128xf32>
    %113 = vector.multi_reduction <add>, %112, %cst_36 [0] : vector<8x128xf32> to vector<128xf32>
    %114 = vector.shape_cast %113 : vector<128xf32> to vector<1x128xf32>
    %115 = arith.mulf %112, %112 : vector<8x128xf32>
    %cst_37 = arith.constant dense<0.000000e+00> : vector<128xf32>
    %116 = vector.multi_reduction <add>, %115, %cst_37 [0] : vector<8x128xf32> to vector<128xf32>
    %117 = vector.shape_cast %116 : vector<128xf32> to vector<1x128xf32>
    %cst_38 = arith.constant 1.250000e-01 : f32
    %118 = vector.broadcast %cst_38 : f32 to vector<1x128xf32>
    %119 = arith.mulf %114, %118 : vector<1x128xf32>
    %cst_39 = arith.constant 1.250000e-01 : f32
    %120 = vector.broadcast %cst_39 : f32 to vector<1x128xf32>
    %121 = arith.mulf %117, %120 : vector<1x128xf32>
    %122 = arith.mulf %119, %119 : vector<1x128xf32>
    %123 = arith.subf %121, %122 : vector<1x128xf32>
    %cst_40 = arith.constant 0.000000e+00 : f32
    %124 = vector.broadcast %cst_40 : f32 to vector<1x128xf32>
    %125 = arith.maximumf %123, %124 : vector<1x128xf32>
    %cst_41 = arith.constant 9.99999974E-6 : f32
    %126 = vector.broadcast %cst_41 : f32 to vector<1x128xf32>
    %127 = arith.addf %125, %126 : vector<1x128xf32>
    %128 = math.rsqrt %127 : vector<1x128xf32>
    %129 = arith.mulf %16, %128 : vector<1x128xf32>
    %130 = arith.mulf %119, %129 : vector<1x128xf32>
    %131 = arith.subf %17, %130 : vector<1x128xf32>
    %132 = vector.broadcast %129 : vector<1x128xf32> to vector<8x128xf32>
    %133 = arith.mulf %112, %132 : vector<8x128xf32>
    %134 = vector.broadcast %131 : vector<1x128xf32> to vector<8x128xf32>
    %135 = arith.addf %133, %134 : vector<8x128xf32>
    %cst_42 = arith.constant 5.000000e-01 : f32
    %136 = vector.broadcast %cst_42 : f32 to vector<8x128xf32>
    %137 = arith.mulf %136, %135 : vector<8x128xf32>
    %cst_43 = arith.constant 0.707106769 : f32
    %138 = vector.broadcast %cst_43 : f32 to vector<8x128xf32>
    %139 = arith.mulf %135, %138 : vector<8x128xf32>
    %140 = math.erf %139 : vector<8x128xf32>
    %cst_44 = arith.constant 1.000000e+00 : f32
    %141 = vector.broadcast %cst_44 : f32 to vector<8x128xf32>
    %142 = arith.addf %141, %140 : vector<8x128xf32>
    %143 = arith.mulf %137, %142 : vector<8x128xf32>
    %144 = arith.addf %143, %105 : vector<8x128xf32>
    %cst_45 = arith.constant 0.70721358 : f32
    %145 = vector.broadcast %cst_45 : f32 to vector<8x128xf32>
    %146 = arith.mulf %144, %145 : vector<8x128xf32>
    %cst_46 = arith.constant dense<0.000000e+00> : vector<8x128xf32>
    %147 = tpu.matmul %146, %31, %cst_46 {dimension_numbers = #tpu.dot_dimension_numbers<[1], [0], [0], [1], [0, 0, 1, 1], [], []>} : vector<8x128xf32>, vector<128x128xf32>, vector<8x128xf32> -> vector<8x128xf32>
    %cst_47 = arith.constant dense<0.000000e+00> : vector<8x128xf32>
    %148 = tpu.matmul %2, %34, %cst_47 {dimension_numbers = #tpu.dot_dimension_numbers<[1], [0], [0], [1], [0, 0, 1, 1], [], []>} : vector<8x8xf32>, vector<8x128xf32>, vector<8x128xf32> -> vector<8x128xf32>
    %149 = arith.addf %147, %148 : vector<8x128xf32>
    %150 = vector.broadcast %3 : vector<8x1xf32> to vector<8x128xf32>
    %151 = vector.broadcast %13 : vector<1x128xf32> to vector<8x128xf32>
    %152 = arith.mulf %150, %151 : vector<8x128xf32>
    %153 = arith.addf %149, %152 : vector<8x128xf32>
    %cst_48 = arith.constant dense<0.000000e+00> : vector<128xf32>
    %154 = vector.multi_reduction <add>, %153, %cst_48 [0] : vector<8x128xf32> to vector<128xf32>
    %155 = vector.shape_cast %154 : vector<128xf32> to vector<1x128xf32>
    %156 = arith.mulf %153, %153 : vector<8x128xf32>
    %cst_49 = arith.constant dense<0.000000e+00> : vector<128xf32>
    %157 = vector.multi_reduction <add>, %156, %cst_49 [0] : vector<8x128xf32> to vector<128xf32>
    %158 = vector.shape_cast %157 : vector<128xf32> to vector<1x128xf32>
    %cst_50 = arith.constant 1.250000e-01 : f32
    %159 = vector.broadcast %cst_50 : f32 to vector<1x128xf32>
    %160 = arith.mulf %155, %159 : vector<1x128xf32>
    %cst_51 = arith.constant 1.250000e-01 : f32
    %161 = vector.broadcast %cst_51 : f32 to vector<1x128xf32>
    %162 = arith.mulf %158, %161 : vector<1x128xf32>
    %163 = arith.mulf %160, %160 : vector<1x128xf32>
    %164 = arith.subf %162, %163 : vector<1x128xf32>
    %cst_52 = arith.constant 0.000000e+00 : f32
    %165 = vector.broadcast %cst_52 : f32 to vector<1x128xf32>
    %166 = arith.maximumf %164, %165 : vector<1x128xf32>
    %cst_53 = arith.constant 9.99999974E-6 : f32
    %167 = vector.broadcast %cst_53 : f32 to vector<1x128xf32>
    %168 = arith.addf %166, %167 : vector<1x128xf32>
    %169 = math.rsqrt %168 : vector<1x128xf32>
    %170 = arith.mulf %18, %169 : vector<1x128xf32>
    %171 = arith.mulf %160, %170 : vector<1x128xf32>
    %172 = arith.subf %19, %171 : vector<1x128xf32>
    %173 = vector.broadcast %170 : vector<1x128xf32> to vector<8x128xf32>
    %174 = arith.mulf %153, %173 : vector<8x128xf32>
    %175 = vector.broadcast %172 : vector<1x128xf32> to vector<8x128xf32>
    %176 = arith.addf %174, %175 : vector<8x128xf32>
    %cst_54 = arith.constant 5.000000e-01 : f32
    %177 = vector.broadcast %cst_54 : f32 to vector<8x128xf32>
    %178 = arith.mulf %177, %176 : vector<8x128xf32>
    %cst_55 = arith.constant 0.707106769 : f32
    %179 = vector.broadcast %cst_55 : f32 to vector<8x128xf32>
    %180 = arith.mulf %176, %179 : vector<8x128xf32>
    %181 = math.erf %180 : vector<8x128xf32>
    %cst_56 = arith.constant 1.000000e+00 : f32
    %182 = vector.broadcast %cst_56 : f32 to vector<8x128xf32>
    %183 = arith.addf %182, %181 : vector<8x128xf32>
    %184 = arith.mulf %178, %183 : vector<8x128xf32>
    %185 = arith.addf %184, %146 : vector<8x128xf32>
    %c0_57 = arith.constant 0 : index
    %c0_58 = arith.constant 0 : index
    %186 = vector.load %arg8[%c0_57, %c0_58] : memref<128x128xf32, #tpu.memory_space<vmem>>, vector<128x128xf32>
    %cst_59 = arith.constant dense<0.000000e+00> : vector<8x128xf32>
    %187 = tpu.matmul %185, %186, %cst_59 {dimension_numbers = #tpu.dot_dimension_numbers<[1], [0], [0], [1], [0, 0, 1, 1], [], []>} : vector<8x128xf32>, vector<128x128xf32>, vector<8x128xf32> -> vector<8x128xf32>
    %c0_60 = arith.constant 0 : index
    %c0_61 = arith.constant 0 : index
    %188 = vector.load %arg9[%c0_60, %c0_61] : memref<8x128xf32, #tpu.memory_space<vmem>>, vector<8x128xf32>
    %cst_62 = arith.constant dense<0.000000e+00> : vector<8x128xf32>
    %189 = tpu.matmul %2, %188, %cst_62 {dimension_numbers = #tpu.dot_dimension_numbers<[1], [0], [0], [1], [0, 0, 1, 1], [], []>} : vector<8x8xf32>, vector<8x128xf32>, vector<8x128xf32> -> vector<8x128xf32>
    %190 = arith.addf %187, %189 : vector<8x128xf32>
    %191 = vector.broadcast %3 : vector<8x1xf32> to vector<8x128xf32>
    %192 = vector.broadcast %20 : vector<1x128xf32> to vector<8x128xf32>
    %193 = arith.mulf %191, %192 : vector<8x128xf32>
    %194 = arith.addf %190, %193 : vector<8x128xf32>
    %195 = vector.broadcast %21 : vector<1x128xf32> to vector<8x128xf32>
    %196 = arith.addf %194, %195 : vector<8x128xf32>
    %c0_63 = arith.constant 0 : index
    %c0_64 = arith.constant 0 : index
    %197 = vector.load %arg10[%c0_63, %c0_64] : memref<8x128xf32, #tpu.memory_space<vmem>>, vector<8x128xf32>
    tpu.vector_store %arg10[%c0_63, %c0_64], %196 {strides = array<i32>} : memref<8x128xf32, #tpu.memory_space<vmem>>, vector<8x128xf32>,
    return
  }
  func.func @transform_0(%arg0: i32) -> (i32, i32) {
    %c0_i32 = arith.constant 0 : i32
    %c0_i32_0 = arith.constant 0 : i32
    %c0_i32_1 = arith.constant 0 : i32
    return %c0_i32, %c0_i32_0 : i32, i32
  }
  func.func @transform_1(%arg0: i32) -> (i32, i32) {
    %c0_i32 = arith.constant 0 : i32
    %c0_i32_0 = arith.constant 0 : i32
    %c0_i32_1 = arith.constant 0 : i32
    return %c0_i32, %c0_i32_0 : i32, i32
  }
  func.func @transform_2(%arg0: i32) -> (i32, i32) {
    %c0_i32 = arith.constant 0 : i32
    %c0_i32_0 = arith.constant 0 : i32
    %c0_i32_1 = arith.constant 0 : i32
    return %c0_i32, %c0_i32_0 : i32, i32
  }
  func.func @transform_3(%arg0: i32) -> (i32, i32) {
    %c0_i32 = arith.constant 0 : i32
    %c0_i32_0 = arith.constant 0 : i32
    %c0_i32_1 = arith.constant 0 : i32
    return %c0_i32, %c0_i32_0 : i32, i32
  }
  func.func @transform_4(%arg0: i32) -> (i32, i32) {
    %c0_i32 = arith.constant 0 : i32
    %c0_i32_0 = arith.constant 0 : i32
    %c0_i32_1 = arith.constant 0 : i32
    return %c0_i32, %c0_i32_0 : i32, i32
  }
  func.func @transform_5(%arg0: i32) -> (i32, i32) {
    %c0_i32 = arith.constant 0 : i32
    %c0_i32_0 = arith.constant 0 : i32
    %c0_i32_1 = arith.constant 0 : i32
    return %c0_i32, %c0_i32_0 : i32, i32
  }
  func.func @transform_6(%arg0: i32) -> (i32, i32) {
    %c0_i32 = arith.constant 0 : i32
    %c0_i32_0 = arith.constant 0 : i32
    %c0_i32_1 = arith.constant 0 : i32
    return %c0_i32, %c0_i32_0 : i32, i32
  }
  func.func @transform_7(%arg0: i32) -> (i32, i32) {
    %c0_i32 = arith.constant 0 : i32
    %c0_i32_0 = arith.constant 0 : i32
    %c0_i32_1 = arith.constant 0 : i32
    return %c0_i32, %c0_i32_0 : i32, i32
  }
  func.func @transform_8(%arg0: i32) -> (i32, i32) {
    %c0_i32 = arith.constant 0 : i32
    %c0_i32_0 = arith.constant 0 : i32
    %c0_i32_1 = arith.constant 0 : i32
    return %c0_i32, %c0_i32_0 : i32, i32
  }
  func.func @transform_9(%arg0: i32) -> (i32, i32) {
    %c0_i32 = arith.constant 0 : i32
    %c0_i32_0 = arith.constant 0 : i32
    %c0_i32_1 = arith.constant 0 : i32
    return %c0_i32, %c0_i32_0 : i32, i32
  }
}

</mosaic_0001>

<bundles_post_ra>
// kernel: tpu_custom_call.1
= control target key start
LH: loop header
LB: loop body
LE: loop exit
PB: predicated region body
PF: predicated region fallthrough
CT: control target
= control target key end

     0   :  { %14 = vsyncpa [#allocation3], 0  ;;  %s2450_s0 = inlined_call_operand.hbm [shape: f32[8,128], index: 0, kind: input, shape index: {}]   ;;  %s2451_s1 = inlined_call_operand.hbm [shape: f32[16,128], index: 1, kind: input, shape index: {}]   ;;  %s2452_s2 = inlined_call_operand.vmem [shape: f32[24,32], index: 2, kind: input, shape index: {}]   ;;  %s2453_s3 = inlined_call_operand.vmem [shape: f32[96,32], index: 3, kind: input, shape index: {}]   ;;  %s2454_s4 = inlined_call_operand.hbm [shape: f32[96,128], index: 4, kind: input, shape index: {}]   ;;  %s2455_s5 = inlined_call_operand.hbm [shape: f32[256,128], index: 5, kind: input, shape index: {}]   ;;  %s2456_s6 = inlined_call_operand.hbm [shape: f32[16,128], index: 6, kind: input, shape index: {}]   ;;  %s2457_s7 = inlined_call_operand.vmem [shape: f32[128,128], index: 7, kind: input, shape index: {}]   ;;  %s2458_s8 = inlined_call_operand.hbm [shape: f32[8,128], index: 8, kind: input, shape index: {}]   ;;  %s2459_s9 = inlined_call_operand.hbm [shape: f32[8,128], index: 9, kind: output, shape index: {}]  }
   0x1   :  { %15 = vsyncpa [#allocation6], 0 }
   0x2   :  { %16 = vsyncpa [#allocation9], 0 }
   0x3   :  { %17 = vsyncpa [#allocation12], 0 }
   0x4   :  { %18 = vsyncpa [#allocation4], 0  ;;  %s1998_s30 = smov [#allocation5]   ;;  %s1834_s13 = scalar_lea.hbm %s2451_s1, 256 }
   0x5   :  { %s34_s10 = sshll.u32 %s1998_s30, 4  ;;  %p1835_p0 = scmp.ne.s32.totalorder %s2451_s1, %s1834_s13  ;;  %s35_s10 = int_to_ptr.vmem [resolvable:$true] %s34_s10 }
   0x6   :  { %p1838_p1 = scmp.lt.u32.totalorder %s1834_s13, %s2451_s1 }
   0x8   :  { %p1840_p2 = pnand %p1838_p1, %p1835_p0 }
   0xa   :  { %1843 = shalt.err (!%p1840_p2)
}
   0xb   :  { %s1844_s18 = scalar_lea.vmem %s35_s10, 256  ;;  %p1849_p4 = scmp.lt.s32.totalorder %s35_s10, %s35_s10 }
   0xc   :  { %p1845_p3 = scmp.ne.s32.totalorder %s35_s10, %s1844_s18  ;;  %p1850_p5 = scmp.lt.s32.totalorder %s1844_s18, %s1844_s18 }
   0xe   :  { %p1851_p6 = por %p1850_p5, %p1849_p4 }
  0x10   :  { %p1852_p7 = pnand %p1851_p6, %p1845_p3 }
  0x12   :  { %1855 = shalt.err (!%p1852_p7)
}
  0x13   :  { %s1999_s19 = smov 128   ;;  %s2000_s20 = smov 8  }
  0x14   :  { %40 = dma.hbm_to_vmem [thread:$0]  %s2451_s1, 256, %s35_s10, [#allocation6], %s1999_s19, %s1999_s19, %s2000_s20  }
  0x15   :  { %s2001_s23 = smov [#allocation8]   ;;  %s2002_s25 = smov [#allocation2]  }
  0x16   :  { %s62_s24 = sshll.u32 %s2001_s23, 4  ;;  %s25_s26 = sshll.u32 %s2002_s25, 4  ;;  %s63_s24 = int_to_ptr.vmem [resolvable:$true] %s62_s24  ;;  %s26_s26 = int_to_ptr.vmem [resolvable:$true] %s25_s26 }
  0x17   :  { %s1856_s29 = scalar_lea.hbm %s2455_s5, 4096 }
  0x18   :  { %p1857_p8 = scmp.ne.s32.totalorder %s2455_s5, %s1856_s29  ;;  %p1860_p9 = scmp.lt.u32.totalorder %s1856_s29, %s2455_s5 }
  0x1a   :  { %p1862_p10 = pnand %p1860_p9, %p1857_p8 }
  0x1c   :  { %1865 = shalt.err (!%p1862_p10)
}
  0x1d   :  { %s1866_s1 = scalar_lea.vmem %s63_s24, 4096  ;;  %p1871_p12 = scmp.lt.s32.totalorder %s63_s24, %s63_s24 }
  0x1e   :  { %p1867_p11 = scmp.ne.s32.totalorder %s63_s24, %s1866_s1  ;;  %p1872_p13 = scmp.lt.s32.totalorder %s1866_s1, %s1866_s1 }
  0x20   :  { %p1873_p0 = por %p1872_p13, %p1871_p12 }
  0x22   :  { %p1874_p1 = pnand %p1873_p0, %p1867_p11 }
  0x24   :  { %1877 = shalt.err (!%p1874_p1)
}
  0x25   :  { %68 = dma.hbm_to_vmem [thread:$0]  %s2455_s5, 4096, %s63_s24, [#allocation9], %s1999_s19, %s1999_s19, %s2000_s20  }
  0x26   :  { %s1878_s17 = scalar_lea.hbm %s2450_s0, 128 }
  0x27   :  { %p1879_p2 = scmp.ne.s32.totalorder %s2450_s0, %s1878_s17  ;;  %p1882_p3 = scmp.lt.u32.totalorder %s1878_s17, %s2450_s0 }
  0x29   :  { %p1884_p4 = pnand %p1882_p3, %p1879_p2 }
  0x2b   :  { %1887 = shalt.err (!%p1884_p4)
}
  0x2c   :  { %s1888_s25 = scalar_lea.vmem %s26_s26, 128  ;;  %p1893_p6 = scmp.lt.s32.totalorder %s26_s26, %s26_s26 }
  0x2d   :  { %p1889_p5 = scmp.ne.s32.totalorder %s26_s26, %s1888_s25  ;;  %p1894_p7 = scmp.lt.s32.totalorder %s1888_s25, %s1888_s25 }
  0x2f   :  { %p1895_p8 = por %p1894_p7, %p1893_p6 }
  0x31   :  { %p1896_p9 = pnand %p1895_p8, %p1889_p5 }
  0x33   :  { %1899 = shalt.err (!%p1896_p9)
}
  0x34   :  { %28 = dma.hbm_to_vmem [thread:$0]  %s2450_s0, 128, %s26_s26, [#allocation3]  }
  0x35   :  { %s2003_s27 = smov [#allocation7]   ;;  %s2004_s29 = smov [#allocation10]  }
  0x36   :  { %s50_s28 = sshll.u32 %s2003_s27, 4  ;;  %s74_s30 = sshll.u32 %s2004_s29, 4  ;;  %s51_s28 = int_to_ptr.vmem [resolvable:$true] %s50_s28  ;;  %s75_s30 = int_to_ptr.vmem [resolvable:$true] %s74_s30 }
  0x37   :  { %s1900_s13 = scalar_lea.hbm %s2454_s4, 1536 }
  0x38   :  { %p1901_p10 = scmp.ne.s32.totalorder %s2454_s4, %s1900_s13  ;;  %p1904_p11 = scmp.lt.u32.totalorder %s1900_s13, %s2454_s4 }
  0x3a   :  { %p1906_p12 = pnand %p1904_p11, %p1901_p10 }
  0x3c   :  { %1909 = shalt.err (!%p1906_p12)
}
  0x3d   :  { %s1910_s0 = scalar_lea.vmem %s51_s28, 1536  ;;  %p1915_p0 = scmp.lt.s32.totalorder %s51_s28, %s51_s28 }
  0x3e   :  { %p1911_p13 = scmp.ne.s32.totalorder %s51_s28, %s1910_s0  ;;  %p1916_p1 = scmp.lt.s32.totalorder %s1910_s0, %s1910_s0 }
  0x40   :  { %p1917_p2 = por %p1916_p1, %p1915_p0 }
  0x42   :  { %p1918_p3 = pnand %p1917_p2, %p1911_p13 }
  0x44   :  { %1921 = shalt.err (!%p1918_p3)
}
  0x45   :  { %56 = dma.hbm_to_vmem [thread:$0]  %s2454_s4, 1536, %s51_s28, [#allocation6], %s1999_s19, %s1999_s19, %s2000_s20  }
  0x46   :  { %s1922_s21 = scalar_lea.hbm %s2456_s6, 256 }
  0x47   :  { %p1923_p4 = scmp.ne.s32.totalorder %s2456_s6, %s1922_s21  ;;  %p1926_p5 = scmp.lt.u32.totalorder %s1922_s21, %s2456_s6 }
  0x49   :  { %p1928_p6 = pnand %p1926_p5, %p1923_p4 }
  0x4b   :  { %1931 = shalt.err (!%p1928_p6)
}
  0x4c   :  { %s1932_s24 = scalar_lea.vmem %s75_s30, 256  ;;  %p1937_p8 = scmp.lt.s32.totalorder %s75_s30, %s75_s30 }
  0x4d   :  { %p1933_p7 = scmp.ne.s32.totalorder %s75_s30, %s1932_s24  ;;  %p1938_p9 = scmp.lt.s32.totalorder %s1932_s24, %s1932_s24 }
  0x4f   :  { %p1939_p10 = por %p1938_p9, %p1937_p8 }
  0x51   :  { %p1940_p11 = pnand %p1939_p10, %p1933_p7 }
  0x53   :  { %1943 = shalt.err (!%p1940_p11)
}
  0x54   :  { %80 = dma.hbm_to_vmem [thread:$0]  %s2456_s6, 256, %s75_s30, [#allocation9], %s1999_s19, %s1999_s19, %s2000_s20  }
  0x55   :  { %s2005_s28 = smov [#allocation11]   ;;  %s1944_s13 = scalar_lea.hbm %s2458_s8, 128 }
  0x56   :  { %s89_s29 = sshll.u32 %s2005_s28, 4  ;;  %p1945_p12 = scmp.ne.s32.totalorder %s2458_s8, %s1944_s13  ;;  %s90_s29 = int_to_ptr.vmem [resolvable:$true] %s89_s29 }
  0x57   :  { %p1948_p13 = scmp.lt.u32.totalorder %s1944_s13, %s2458_s8 }
  0x59   :  { %p1950_p0 = pnand %p1948_p13, %p1945_p12 }
  0x5b   :  { %1953 = shalt.err (!%p1950_p0)
}
  0x5c   :  { %s1954_s0 = scalar_lea.vmem %s90_s29, 128  ;;  %p1959_p2 = scmp.lt.s32.totalorder %s90_s29, %s90_s29 }
  0x5d   :  { %p1955_p1 = scmp.ne.s32.totalorder %s90_s29, %s1954_s0  ;;  %p1960_p3 = scmp.lt.s32.totalorder %s1954_s0, %s1954_s0 }
  0x5f   :  { %p1961_p4 = por %p1960_p3, %p1959_p2 }
  0x61   :  { %p1962_p5 = pnand %p1961_p4, %p1955_p1 }
  0x63   :  { %1965 = shalt.err (!%p1962_p5)
}
  0x64   :  { %92 = dma.hbm_to_vmem [thread:$0]  %s2458_s8, 128, %s90_s29, [#allocation12]  }
  0x65   :  { %1988 = dma.done.wait [#allocation3], 128  }
  0x66   :  { %1989 = vsyncadd [#allocation3], 4294967168 }
  0x67   :  { %1990 = dma.done.wait [#allocation6], 1792  }
  0x68   :  { %1991 = vsyncadd [#allocation6], 4294965504 }
  0x69   :  { %1992 = dma.done.wait [#allocation9], 4352  }
  0x6a   :  { %1993 = vsyncadd [#allocation9], 4294962944 }
  0x6b   :  { %1994 = dma.done.wait [#allocation12], 128  }
  0x6c   :  { %1995 = vsyncadd [#allocation12], 4294967168  ;;  %v2006_v0 = vmov 24   ;;  %v2007_v1 = vmov 0.0|0.0   ;;  %vm2008_vm0 = vmmov 0   ;;  %v2009_v2 = vmov 0.0  }
  0x6d   :  { %1815 = vset.pattern.permute.xlu0 %v2006_v0  ;;  %1677 = vmatprep.subr.bf16.mxu0 %v2007_v1  ;;  %v2161_v3 = vld [vmem:[#allocation2] sm:$0xff]  ;;  %v115_v5 = vld [vmem:[%s2452_s2 + $0x8] sm:$0xff]  ;;  %s2010_s16 = smov 112   ;;  %v116_v7 = vld [vmem:[%s2452_s2 + $0x10] sm:$0xff]  ;;  %vm167_vm1 = vcmask 130048   ;;  %vm328_vm2 = vcmask 64512   ;;  %v163_v20 = vlaneseq }
  0x6e   :  { %1489 = vmatprep.mubr.msk.f32.mxu0 %vm2008_vm0, %v2009_v2  ;;  %1503 = vmatprep.subr.mxu1 %v2009_v2  ;;  %v114_v4 = vld [vmem:[%s2452_s2] sm:$0xff]  ;;  %v118_v9 = vld [vmem:[%s2453_s3 + $0x8] sm:$0xff]  ;;  %v119_v11 = vld [vmem:[%s2453_s3 + $0x10] sm:$0xff]  ;;  %v2011_v43 = vmov 683565275   ;;  %s2019_s26 = smov 64  }
  0x6f   :  { %1505 = vmatprep.mubr.msk.f32.mxu1 %vm2008_vm0, %v2009_v2  ;;  %326 = vrot.lane.b32.xlu0 %v2161_v3, %s2010_s16  ;;  %v1678_v6 = vpack.c.bf16 %v115_v5, %v114_v4  ;;  %v117_v8 = vld [vmem:[%s2453_s3] sm:$0xff]  ;;  %v120_v12 = vld [vmem:[%s2453_s3 + $0x18] sm:$0xff]  ;;  %v126_v15 = vld [vmem:[%s2453_s3 + $0x48] sm:$0xff]  ;;  %v2212_v22 = vshrl.u32 %v163_v20, 7  ;;  %v2012_v45 = vmov 2475754826  }
  0x70   :  { %1504 = vmatpush3.msra.mxu1 %v116_v7  ;;  %v1681_v10 = vpack.c.bf16 %v118_v9, %v117_v8  ;;  %v1684_v13 = vpack.c.bf16 %v120_v12, %v119_v11  ;;  %v125_v14 = vld [vmem:[%s2453_s3 + $0x40] sm:$0xff]  ;;  %v127_v17 = vld [vmem:[%s2453_s3 + $0x50] sm:$0xff]  ;;  %v128_v18 = vld [vmem:[%s2453_s3 + $0x58] sm:$0xff]  ;;  %v2013_v47 = vmov 2131351028  }
  0x71   :  { %1679 = vmatpush3.bf16.msra.mxu0 %v1678_v6  ;;  %1692 = vmatprep.subr.bf16.mxu1 %v2007_v1  ;;  %v1693_v16 = vpack.c.bf16 %v126_v15, %v125_v14  ;;  %v1696_v21 = vpack.c.bf16 %v128_v18, %v127_v17  ;;  %v487_v23 = vsub.s32 0, %v2212_v22  ;;  %v960_v24 = vsub.s32 6, %v2212_v22  ;;  %v2217_v25 = vld [vmem:[#allocation5] sm:$0xff]  ;;  %v2219_v26 = vld [vmem:[#allocation5 + $0x8] sm:$0xff] }
  0x72   :  { %1680 = vmatprep.subr.bf16.mxu0 %v2007_v1  ;;  %v2014_v49 = vmov 2102212464   ;;  %v2015_v51 = vmov 920167782   ;;  %v2016_v58 = vmov 1326507024  }
  0x73   :  { %482 = vperm.xlu0 %1815, %v2161_v3   ;;  %v488_v27 = vrot.slane %v2217_v25, %v487_v23  ;;  %v1355_v28 = vrot.slane %v2219_v26, %v960_v24 }
  0x74   :  { %1490 = vmatmul.mubr.msk.f32.vlgmr.msra.gmra.mrb[0].mxu0 %vm167_vm1, %v2161_v3  ;;  %vm248_vm1 = vcmask 261120  }
  0x75   :  { %1500 = vmatprep.mubr.msk.f32.mxu0 %vm2008_vm0, %v2009_v2  ;;  %1682 = vmatpush3.bf16.msra.mxu0 %v1681_v10 }
  0x76   :  { %1683 = vmatprep.subr.bf16.mxu0 %v2007_v1 }
  0x79   :  { %1685 = vmatpush3.bf16.msra.mxu0 %v1684_v13 }
  0x7a   :  { %1686 = vmatprep.subr.bf16.mxu0 %v2007_v1 }
  0xe1   :  { %v2205_v19 = vpop.permute.xlu0 %326 }
  0xe2   :  { %1506 = vmatmul.mubr.msk.f32.vlgmr.msra.gmra.mrb[0].mxu1 %vm328_vm2, %v2205_v19 }
  0xe3   :  { %1694 = vmatpush3.bf16.msra.mxu1 %v1693_v16  ;;  %1527 = vmatprep.mubr.msk.f32.mxu1 %vm2008_vm0, %v2009_v2 }
  0xe4   :  { %1695 = vmatprep.subr.bf16.mxu1 %v2007_v1 }
  0xe7   :  { %1697 = vmatpush3.bf16.msra.mxu1 %v1696_v21 }
  0xe8   :  { %1557 = vmatprep.subr.mxu1 %v2009_v2 }
  0xf2   :  { %v2227_v29 = vpop.permute.xlu0 %482 }
  0xf3   :  { %v2230_v30 = vmul.f32 %v488_v27, %v2227_v29  ;;  %v2233_v31 = vmul.f32 %v1355_v28, %v2227_v29 }
  0xf5   :  { %v493_v32 = vand.u32 2139095040, %v2230_v30  ;;  %v490_v34 = vand.u32 2147483647, %v2230_v30  ;;  %vm492_vm10 = vcmp.lt.s32.totalorder %v2230_v30, 0  ;;  %vm582_vm15 = vweird.f32 %v2230_v30 }
  0xf7   :  { %v494_v33 = vshrl.u32 %v493_v32, 23  ;;  %v497_v37 = vand.u32 8388607, %v490_v34  ;;  %vm491_vm11 = vcmp.le.f32.partialorder %v490_v34, 0.7853982  ;;  %v165_v34 = vsub.s32 1, %v2212_v22 }
  0xf9   :  { %v1386_v35 = vadd.s32 4294967169, %v494_v33  ;;  %v498_v40 = vor.u32 8388608, %v497_v37 }
  0xfb   :  { %v500_v36 = vadd.s32 1, %v1386_v35  ;;  %v538_v60 = vshll.u32 %v498_v40, 8 }
  0xfd   :  { %vm501_vm3 = vcmp.gt.s32.totalorder %v500_v36, 0 }
  0xfe   :  { %v502_v38 = vsel %vm501_vm3, %v500_v36, 0 }
  0xff   :  { %v504_v39 = vand.u32 31, %v502_v38  ;;  %v503_v41 = vshrl.u32 %v502_v38, 5 }
 0x101   :  { %v505_v42 = vsub.s32 32, %v504_v39  ;;  %v507_v44 = vshll.u32 %v2011_v43, %v504_v39  ;;  %v510_v46 = vshll.u32 %v2012_v45, %v504_v39  ;;  %v513_v48 = vshll.u32 %v2013_v47, %v504_v39 }
 0x102   :  { %v516_v50 = vshll.u32 %v2014_v49, %v504_v39  ;;  %v519_v52 = vshll.u32 %v2015_v51, %v504_v39  ;;  %vm522_vm4 = vcmp.lt.s32.totalorder %v503_v41, 1  ;;  %vm525_vm5 = vcmp.lt.s32.totalorder %v503_v41, 4 }
 0x103   :  { %v506_v53 = vshrl.u32 %v2011_v43, %v505_v42  ;;  %v508_v54 = vshrl.u32 %v2012_v45, %v505_v42  ;;  %v511_v55 = vshrl.u32 %v2013_v47, %v505_v42  ;;  %v514_v56 = vshrl.u32 %v2014_v49, %v505_v42 }
 0x104   :  { %v517_v57 = vshrl.u32 %v2015_v51, %v505_v42  ;;  %v520_v59 = vshrl.u32 %v2016_v58, %v505_v42  ;;  %vm523_vm6 = vcmp.lt.s32.totalorder %v503_v41, 2  ;;  %vm524_vm7 = vcmp.lt.s32.totalorder %v503_v41, 3 }
 0x105   :  { %v509_v61 = vor.u32 %v508_v54, %v507_v44  ;;  %v512_v62 = vor.u32 %v511_v55, %v510_v46  ;;  %v515_v63 = vor.u32 %v514_v56, %v513_v48 }
 0x106   :  { %v518_v0 = vor.u32 %v517_v57, %v516_v50  ;;  %v521_v4 = vor.u32 %v520_v59, %v519_v52 }
 0x107   :  { %v526_v5 = vsel %vm522_vm4, %v506_v53, %v509_v61  ;;  %v527_v6 = vsel %vm525_vm5, %v515_v63, 2102212464  ;;  %v530_v7 = vsel %vm522_vm4, %v509_v61, %v512_v62  ;;  %v534_v8 = vsel %vm522_vm4, %v512_v62, %v515_v63 }
 0x108   :  { %v528_v9 = vsel %vm524_vm7, %v512_v62, %v527_v6  ;;  %v531_v10 = vsel %vm525_vm5, %v518_v0, 920167782  ;;  %v535_v11 = vsel %vm525_vm5, %v521_v4, 1326507024  ;;  %v2017_v4 = vmov 25  }
 0x109   :  { %v532_v12 = vsel %vm524_vm7, %v515_v63, %v531_v10  ;;  %v536_v13 = vsel %vm524_vm7, %v518_v0, %v535_v11  ;;  %v529_v14 = vsel %vm523_vm6, %v526_v5, %v528_v9  ;;  %v671_v63 = vsub.f32 1.0, %v2161_v3  ;;  %1816 = vset.pattern.permute.xlu1 %v2017_v4  ;;  %1817 = vset.pattern.permute.xlu0 %v2017_v4 }
 0x10a   :  { %v533_v15 = vsel %vm523_vm6, %v530_v7, %v532_v12  ;;  %v537_v16 = vsel %vm523_vm6, %v534_v8, %v536_v13  ;;  %v545_v27 = vmul.u32 %v538_v60, %v529_v14  ;;  %v166_v11 = vrot.slane %v2217_v25, %v165_v34  ;;  %v161_v13 = vld [vmem:[#allocation10] sm:$0xff] }
 0x10b   :  { %v2239_v17 = vmul.u32.u64.low %v538_v60, %v537_v16  ;;  %v2240_v18 = vmul.u32.u64.high %v538_v60, %v537_v16, %v2239_v17  ;;  %v2242_v20 = vmul.u32.u64.low %v538_v60, %v533_v15  ;;  %v2243_v21 = vmul.u32.u64.high %v538_v60, %v533_v15, %v2242_v20  ;;  %v121_v16 = vld [vmem:[%s2453_s3 + $0x20] sm:$0xff] }
 0x10c   :  { %v672_v5 = vsub.f32 0.0, %v671_v63  ;;  %v700_v63 = vld [vmem:[#allocation7 + $0x50] sm:$0xff]  ;;  %vm688_vm5 = vcmask 523264   ;;  %vm702_vm6 = vcmask 785408  }
 0x10d   :  { %vm547_vm8 = vc.u32 %v2240_v18, %v2242_v20  ;;  %v548_v28 = vadd.s32 1, %v2243_v21  ;;  %v546_v43 = vadd.s32 %v2242_v20, %v2240_v18 }
 0x10e   :  { %675 = vperm.xlu1 %1816, %v672_v5   ;;  %v406_v5 = vsub.s32 4, %v2212_v22 }
 0x10f   :  { %v549_v32 = vsel %vm547_vm8, %v548_v28, %v2243_v21  ;;  %v124_v28 = vld [vmem:[%s2453_s3 + $0x38] sm:$0xff] }
 0x110   :  { %v550_v33 = vadd.s32 %v549_v32, %v545_v27  ;;  %v123_v27 = vld [vmem:[%s2453_s3 + $0x30] sm:$0xff] }
 0x112   :  { %v551_v35 = vadd.s32 536870912, %v550_v33 }
 0x114   :  { %v552_v36 = vshrl.u32 %v551_v35, 30  ;;  %v324_v35 = vsub.s32 3, %v2212_v22 }
 0x116   :  { %v553_v37 = vshll.u32 %v552_v36, 30  ;;  %v576_v55 = vsub.s32 4, %v552_v36 }
 0x118   :  { %v554_v38 = vsub.s32 %v550_v33, %v553_v37  ;;  %v577_v58 = vsel %vm492_vm10, %v576_v55, %v552_v36  ;;  %v1690_v33 = vpack.c.bf16 %v124_v28, %v123_v27  ;;  %v325_v36 = vrot.slane %v2217_v25, %v324_v35  ;;  %v129_v27 = vld [vmem:[#allocation8] sm:$0xff]  ;;  %v130_v28 = vld [vmem:[#allocation8 + $0x8] sm:$0xff] }
 0x119   :  { %v579_v61 = vsel %vm491_vm11, 0, %v577_v58 }
 0x11a   :  { %v556_v39 = vsub.s32 0, %v554_v38  ;;  %v583_v62 = vadd.s32 3, %v579_v61  ;;  %v699_v61 = vld [vmem:[#allocation7 + $0x48] sm:$0xff] }
 0x11c   :  { %v1387_v40 = vmin.u32 %v556_v39, %v554_v38  ;;  %v584_v0 = vand.u32 3, %v583_v62 }
 0x11e   :  { %v558_v41 = vclz %v1387_v40  ;;  %vm589_vm12 = vcmp.eq.s32.totalorder %v584_v0, 2  ;;  %vm586_vm13 = vcmp.eq.s32.totalorder %v584_v0, 0  ;;  %vm585_vm14 = vcmp.lt.s32.totalorder %v584_v0, 2  ;;  %v701_v0 = vld [vmem:[#allocation7 + $0x58] sm:$0xff] }
 0x11f   :  { %v1714_v4 = vpack.c.bf16 %v701_v0, %v700_v63 }
 0x120   :  { %v1388_v42 = vadd.s32 4294967294, %v558_v41 }
 0x122   :  { %vm1389_vm9 = vcmp.lt.s32.totalorder %v1388_v42, 0 }
 0x123   :  { %v561_v44 = vsel %vm1389_vm9, 0, %v1388_v42  ;;  %v690_v42 = vld [vmem:[#allocation7] sm:$0xff] }
 0x124   :  { %v562_v45 = vsub.s32 32, %v561_v44  ;;  %v563_v46 = vshll.u32 %v554_v38, %v561_v44  ;;  %v566_v47 = vsub.s32 4294967266, %v561_v44  ;;  %v692_v44 = vld [vmem:[#allocation7 + $0x10] sm:$0xff] }
 0x126   :  { %v564_v48 = vshrl.u32 %v546_v43, %v562_v45  ;;  %v567_v49 = vadd.s32 127, %v566_v47  ;;  %v691_v43 = vld [vmem:[#allocation7 + $0x8] sm:$0xff] }
 0x127   :  { %v1699_v45 = vpack.c.bf16 %v691_v43, %v690_v42  ;;  %v136_v42 = vld [vmem:[#allocation8 + $0x38] sm:$0xff] }
 0x128   :  { %v565_v50 = vor.u32 %v564_v48, %v563_v46  ;;  %v568_v51 = vshll.u32 %v567_v49, 23  ;;  %v693_v46 = vld [vmem:[#allocation7 + $0x18] sm:$0xff]  ;;  %v694_v48 = vld [vmem:[#allocation7 + $0x20] sm:$0xff]  ;;  %v695_v49 = vld [vmem:[#allocation7 + $0x28] sm:$0xff] }
 0x129   :  { %v1702_v47 = vpack.c.bf16 %v693_v46, %v692_v44  ;;  %v137_v44 = vld [vmem:[#allocation8 + $0x40] sm:$0xff] }
 0x12a   :  { %v569_v52 = vor.u32 4788187, %v568_v51  ;;  %v572_v53 = vcvt.s32.f32 %v565_v50 }
 0x12c   :  { %v570_v54 = vand.u32 2147483647, %v569_v52  ;;  %v1705_v52 = vpack.c.bf16 %v695_v49, %v694_v48  ;;  %v140_v48 = vld [vmem:[#allocation8 + $0x58] sm:$0xff] }
 0x12e   :  { %v573_v56 = vmul.f32 %v572_v53, %v570_v54  ;;  %v696_v53 = vld [vmem:[#allocation7 + $0x30] sm:$0xff]  ;;  %v697_v54 = vld [vmem:[#allocation7 + $0x38] sm:$0xff] }
 0x12f   :  { %v1708_v58 = vpack.c.bf16 %v697_v54, %v696_v53  ;;  %v143_v53 = vld [vmem:[#allocation8 + $0x70] sm:$0xff]  ;;  %v144_v54 = vld [vmem:[#allocation8 + $0x78] sm:$0xff] }
 0x130   :  { %v574_v57 = vxor.u32 2147483648, %v573_v56 }
 0x132   :  { %v575_v59 = vsel %vm492_vm10, %v574_v57, %v573_v56 }
 0x133   :  { %v578_v60 = vsel %vm491_vm11, %v2230_v30, %v575_v59  ;;  %v122_v30 = vld [vmem:[%s2453_s3 + $0x28] sm:$0xff]  ;;  %s2018_s3 = smov 32  }
 0x134   :  { %1818 = vcosq.f32 %v578_v60  ;;  %v1687_v21 = vpack.c.bf16 %v122_v30, %v121_v16 }
 0x135   :  { %1820 = vsinq.f32 %v578_v60  ;;  %v698_v60 = vld [vmem:[#allocation7 + $0x40] sm:$0xff] }
 0x136   :  { %v1711_v62 = vpack.c.bf16 %v699_v61, %v698_v60 }
 0x13e   :  { %v1819_v6 = vpop.eup %1818 }
 0x13f   :  { %v1821_v7 = vpop.eup %1820  ;;  %v590_v8 = vxor.u32 2147483648, %v1819_v6 }
 0x140   :  { %v587_v9 = vxor.u32 2147483648, %v1821_v7 }
 0x141   :  { %v591_v10 = vsel %vm589_vm12, %v590_v8, %v1821_v7  ;;  %v407_v7 = vrot.slane %v2217_v25, %v406_v5 }
 0x142   :  { %v588_v3 = vsel %vm586_vm13, %v1819_v6, %v587_v9  ;;  %v596_v6 = vsub.s32 5, %v2212_v22 }
 0x143   :  { %v592_v12 = vsel %vm585_vm14, %v588_v3, %v591_v10 }
 0x144   :  { %v593_v14 = vsel %vm582_vm15, nan, %v592_v12  ;;  %v597_v9 = vrot.slane %v2217_v25, %v596_v6  ;;  %v246_v12 = vsub.s32 2, %v2212_v22 }
 0x145   :  { %1528 = vmatmul.mubr.msk.f32.vlgmr.msra.gmra.mrb[2].mxu1 %vm248_vm1, %v593_v14 }
 0x146   :  { %1558 = vmatpush3.msra.mxu1 %v161_v13  ;;  %1559 = vmatprep.mubr.msk.f32.mxu1 %vm2008_vm0, %v2009_v2  ;;  %v247_v13 = vrot.slane %v2217_v25, %v246_v12 }
 0x147   :  { %v237_v15 = vpop.f32.mrb[0].mxu0  ;;  %1716 = vmatprep.subr.bf16.mxu1 %v2007_v1 }
 0x148   :  { %v238_v17 = vadd.f32 %v237_v15, %v166_v11  ;;  %v1491_v18 = vpop.f32.mrb[1].mxu0 }
 0x149   :  { %1560 = vmatmul.mubr.msk.f32.vlgmr.msra.gmra.mrb[4].mxu1 %vm328_vm2, %v2205_v19 }
 0x14a   :  { %vm241_vm3 = vcmp.ge.f32.partialorder %v238_v17, 0.0  ;;  %v242_v20 = vmul.f32 0.01, %v238_v17  ;;  %1594 = vmatprep.mubr.msk.f32.mxu1 %vm2008_vm0, %v2009_v2 }
 0x14c   :  { %v243_v32 = vsel %vm241_vm3, %v238_v17, %v242_v20  ;;  %v162_v20 = vld [vmem:[#allocation10 + $0x8] sm:$0xff] }
 0x14d   :  { %1501 = vmatmul.mubr.msk.f32.vlgmr.msra.gmra.mrb[2].mxu0 %vm248_vm1, %v243_v32  ;;  %v1717_v32 = vpack.c.bf16 %v130_v28, %v129_v27 }
 0x14e   :  { %1688 = vmatpush3.bf16.msra.mxu0 %v1687_v21  ;;  %1516 = vmatprep.mubr.msk.f32.mxu0 %vm2008_vm0, %v2009_v2 }
 0x14f   :  { %1689 = vmatprep.subr.bf16.mxu0 %v2007_v1  ;;  %1718 = vmatpush3.bf16.msra.mxu1 %v1717_v32 }
 0x150   :  { %1719 = vmatprep.subr.bf16.mxu1 %v2007_v1 }
 0x152   :  { %1691 = vmatpush3.bf16.msra.mxu0 %v1690_v33  ;;  %v131_v33 = vld [vmem:[#allocation8 + $0x10] sm:$0xff] }
 0x153   :  { %1698 = vmatprep.subr.bf16.mxu0 %v2007_v1 }
 0x18d   :  { %v676_v14 = vpop.permute.xlu1 %675 }
 0x1b5   :  { %v397_v37 = vpop.f32.mrb[0].mxu1 }
 0x1b6   :  { %v398_v38 = vadd.f32 %v397_v37, %v325_v36  ;;  %v1507_v39 = vpop.f32.mrb[1].mxu1  ;;  %v132_v36 = vld [vmem:[#allocation8 + $0x18] sm:$0xff] }
 0x1b7   :  { %v1720_v37 = vpack.c.bf16 %v132_v36, %v131_v33  ;;  %v134_v39 = vld [vmem:[#allocation8 + $0x28] sm:$0xff] }
 0x1b8   :  { %vm401_vm4 = vcmp.ge.f32.partialorder %v398_v38, 0.0  ;;  %v402_v40 = vmul.f32 0.01, %v398_v38 }
 0x1b9   :  { %1721 = vmatpush3.bf16.msra.mxu1 %v1720_v37 }
 0x1ba   :  { %v403_v41 = vsel %vm401_vm4, %v398_v38, %v402_v40  ;;  %1722 = vmatprep.subr.bf16.mxu1 %v2007_v1  ;;  %v133_v38 = vld [vmem:[#allocation8 + $0x20] sm:$0xff] }
 0x1bb   :  { %1517 = vmatmul.mubr.msk.f32.vlgmr.msra.gmra.mrb[4].mxu0 %vm248_vm1, %v403_v41  ;;  %v1723_v40 = vpack.c.bf16 %v134_v39, %v133_v38  ;;  %v135_v41 = vld [vmem:[#allocation8 + $0x30] sm:$0xff] }
 0x1bc   :  { %1554 = vmatprep.mubr.msk.f32.mxu0 %vm2008_vm0, %v2009_v2  ;;  %1700 = vmatpush3.bf16.msra.mxu0 %v1699_v45  ;;  %v1726_v43 = vpack.c.bf16 %v136_v42, %v135_v41  ;;  %v138_v45 = vld [vmem:[#allocation8 + $0x48] sm:$0xff] }
 0x1bd   :  { %1701 = vmatprep.subr.bf16.mxu0 %v2007_v1  ;;  %1724 = vmatpush3.bf16.msra.mxu1 %v1723_v40  ;;  %v1729_v46 = vpack.c.bf16 %v138_v45, %v137_v44 }
 0x1be   :  { %1725 = vmatprep.subr.bf16.mxu1 %v2007_v1 }
 0x1c0   :  { %1703 = vmatpush3.bf16.msra.mxu0 %v1702_v47  ;;  %v139_v47 = vld [vmem:[#allocation8 + $0x50] sm:$0xff] }
 0x1c1   :  { %1704 = vmatprep.subr.bf16.mxu0 %v2007_v1  ;;  %1727 = vmatpush3.bf16.msra.mxu1 %v1726_v43  ;;  %v1732_v49 = vpack.c.bf16 %v140_v48, %v139_v47  ;;  %v147_v48 = vld [vmem:[#allocation8 + $0x90] sm:$0xff] }
 0x1c2   :  { %1728 = vmatprep.subr.bf16.mxu1 %v2007_v1 }
 0x1c4   :  { %1706 = vmatpush3.bf16.msra.mxu0 %v1705_v52 }
 0x1c5   :  { %1707 = vmatprep.subr.bf16.mxu0 %v2007_v1  ;;  %1730 = vmatpush3.bf16.msra.mxu1 %v1729_v46  ;;  %v1211_v46 = vld [vmem:[#allocation11] sm:$0xff] }
 0x1c6   :  { %1731 = vmatprep.subr.bf16.mxu1 %v2007_v1 }
 0x1c8   :  { %1709 = vmatpush3.bf16.msra.mxu0 %v1708_v58 }
 0x1c9   :  { %1710 = vmatprep.subr.bf16.mxu0 %v2007_v1  ;;  %1733 = vmatpush3.bf16.msra.mxu1 %v1732_v49  ;;  %v148_v49 = vld [vmem:[#allocation8 + $0x98] sm:$0xff] }
 0x1ca   :  { %1734 = vmatprep.subr.bf16.mxu1 %v2007_v1 }
 0x1cc   :  { %1712 = vmatpush3.bf16.msra.mxu0 %v1711_v62 }
 0x1cd   :  { %1713 = vmatprep.subr.bf16.mxu0 %v2007_v1 }
 0x1d0   :  { %1715 = vmatpush3.bf16.msra.mxu0 %v1714_v4 }
 0x1d1   :  { %1597 = vmatprep.subr.mxu0 %v2009_v2 }
 0x218   :  { %v667_v50 = vpop.f32.mrb[2].mxu1 }
 0x219   :  { %v1529_v51 = vpop.f32.mrb[3].mxu1  ;;  %v668_v11 = vadd.f32 %v667_v50, %v597_v9  ;;  %v141_v50 = vld [vmem:[#allocation8 + $0x60] sm:$0xff] }
 0x21a   :  { %v142_v51 = vld [vmem:[#allocation8 + $0x68] sm:$0xff] }
 0x21b   :  { %v1735_v52 = vpack.c.bf16 %v142_v51, %v141_v50  ;;  %v1744_v50 = vpack.c.bf16 %v148_v49, %v147_v48  ;;  %v149_v51 = vld [vmem:[#allocation8 + $0xa0] sm:$0xff] }
 0x21c   :  { %v2293_v55 = vpop.f32.mrb[4].mxu1 }
 0x21d   :  { %v1561_v56 = vpop.f32.mrb[5].mxu1  ;;  %1736 = vmatpush3.bf16.msra.mxu1 %v1735_v52  ;;  %v150_v52 = vld [vmem:[#allocation8 + $0xa8] sm:$0xff] }
 0x21e   :  { %v1738_v56 = vpack.c.bf16 %v144_v54, %v143_v53  ;;  %1737 = vmatprep.subr.bf16.mxu1 %v2007_v1  ;;  %v1747_v53 = vpack.c.bf16 %v150_v52, %v149_v51  ;;  %v152_v54 = vld [vmem:[#allocation8 + $0xb8] sm:$0xff] }
 0x220   :  { %v318_v57 = vpop.f32.mrb[2].mxu0 }
 0x221   :  { %v1502_v59 = vpop.f32.mrb[3].mxu0  ;;  %v319_v15 = vadd.f32 %v318_v57, %v247_v13  ;;  %1739 = vmatpush3.bf16.msra.mxu1 %v1738_v56  ;;  %v153_v56 = vld [vmem:[#allocation8 + $0xc0] sm:$0xff] }
 0x222   :  { %1637 = vmatprep.subr.mxu1 %v2009_v2 }
 0x223   :  { %v678_v30 = vmul.f32 %v676_v14, %v319_v15 }
 0x28e   :  { %v477_v8 = vpop.f32.mrb[4].mxu0 }
 0x28f   :  { %v478_v10 = vadd.f32 %v477_v8, %v407_v7  ;;  %v1518_v3 = vpop.f32.mrb[5].mxu0 }
 0x291   :  { %680 = vrot.lane.b32.xlu1 %v478_v10, %s2018_s3 }
 0x295   :  { %684 = vrot.lane.b32.xlu1 %v668_v11, %s2019_s26 }
 0x303   :  { %v681_v16 = vpop.permute.xlu1 %680 }
 0x304   :  { %v687_v17 = vsel %vm248_vm1, %v678_v30, %v681_v16 }
 0x307   :  { %v685_v18 = vpop.permute.xlu1 %684 }
 0x308   :  { %v689_v21 = vsel %vm688_vm5, %v687_v17, %v685_v18 }
 0x309   :  { %1555 = vmatmul.mubr.msk.f32.vlgmr.msra.gmra.mrb[6].mxu0 %vm702_vm6, %v689_v21 }
 0x30a   :  { %1598 = vmatpush3.msra.mxu0 %v162_v20  ;;  %1599 = vmatprep.mubr.msk.f32.mxu0 %vm2008_vm0, %v2009_v2 }
 0x30b   :  { %1740 = vmatprep.subr.bf16.mxu0 %v2007_v1 }
 0x30d   :  { %1600 = vmatmul.mubr.msk.f32.vlgmr.msra.gmra.mrb[8].mxu0 %vm328_vm2, %v2205_v19 }
 0x30e   :  { %1634 = vmatprep.mubr.msk.f32.mxu0 %vm2008_vm0, %v2009_v2 }
 0x3dc   :  { %v772_v57 = vpop.f32.mrb[6].mxu0 }
 0x3dd   :  { %v776_v58 = vrot.slane %v772_v57, 4  ;;  %v782_v59 = vmul.f32 %v772_v57, %v772_v57  ;;  %v1556_v60 = vpop.f32.mrb[7].mxu0 }
 0x3de   :  { %v156_v60 = vld [vmem:[#allocation8 + $0xd8] sm:$0xff] }
 0x3df   :  { %v777_v61 = vadd.f32 %v776_v58, %v772_v57  ;;  %v783_v62 = vrot.slane %v782_v59, 4 }
 0x3e0   :  { %v2327_v63 = vpop.f32.mrb[8].mxu0 }
 0x3e1   :  { %v778_v0 = vrot.slane %v777_v61, 2  ;;  %v784_v4 = vadd.f32 %v783_v62, %v782_v59  ;;  %v1601_v7 = vpop.f32.mrb[9].mxu0  ;;  %v155_v59 = vld [vmem:[#allocation8 + $0xd0] sm:$0xff]  ;;  %v157_v62 = vld [vmem:[#allocation8 + $0xe0] sm:$0xff] }
 0x3e2   :  { %v159_v7 = vld [vmem:[#allocation8 + $0xf0] sm:$0xff] }
 0x3e3   :  { %v779_v8 = vadd.f32 %v778_v0, %v777_v61  ;;  %v785_v9 = vrot.slane %v784_v4, 2  ;;  %v1756_v61 = vpack.c.bf16 %v156_v60, %v155_v59  ;;  %v158_v0 = vld [vmem:[#allocation8 + $0xe8] sm:$0xff]  ;;  %v1198_v60 = vld [vmem:[%s2457_s7 + $0x18] sm:$0xff] }
 0x3e5   :  { %v780_v10 = vrot.slane %v779_v8, 1  ;;  %v786_v3 = vadd.f32 %v785_v9, %v784_v4  ;;  %v1759_v4 = vpack.c.bf16 %v158_v0, %v157_v62  ;;  %v1199_v62 = vld [vmem:[%s2457_s7 + $0x20] sm:$0xff]  ;;  %v1200_v0 = vld [vmem:[%s2457_s7 + $0x28] sm:$0xff] }
 0x3e7   :  { %v781_v11 = vadd.f32 %v780_v10, %v779_v8  ;;  %v787_v13 = vrot.slane %v786_v3, 1  ;;  %v160_v8 = vld [vmem:[#allocation8 + $0xf8] sm:$0xff]  ;;  %v961_v10 = vrot.slane %v2217_v25, %v960_v24 }
 0x3e8   :  { %v1762_v9 = vpack.c.bf16 %v160_v8, %v159_v7  ;;  %v1201_v7 = vld [vmem:[%s2457_s7 + $0x30] sm:$0xff]  ;;  %v1202_v8 = vld [vmem:[%s2457_s7 + $0x38] sm:$0xff] }
 0x3e9   :  { %v788_v14 = vadd.f32 %v787_v13, %v786_v3  ;;  %v789_v15 = vmul.f32 0.125, %v781_v11  ;;  %v962_v11 = vmul.f32 %v961_v10, %v2227_v29  ;;  %v1203_v10 = vld [vmem:[%s2457_s7 + $0x40] sm:$0xff] }
 0x3eb   :  { %v790_v16 = vmul.f32 0.125, %v788_v14  ;;  %v791_v30 = vmul.f32 %v789_v15, %v789_v15 }
 0x3ed   :  { %v792_v17 = vsub.f32 %v790_v16, %v791_v30 }
 0x3ef   :  { %v793_v18 = vmax.f32 %v792_v17, 0.0 }
 0x3f1   :  { %v794_v20 = vadd.f32 1e-05, %v793_v18 }
 0x3f3   :  { %1822 = vrsqrt.f32 %v794_v20 }
 0x3fd   :  { %v1823_v21 = vpop.eup %1822 }
 0x3fe   :  { %v796_v27 = vmul.f32 %v1823_v21, %v2219_v26 }
 0x400   :  { %v797_v28 = vmul.f32 %v796_v27, %v789_v15  ;;  %v805_v33 = vrot.slane %v796_v27, %v487_v23  ;;  %v145_v23 = vld [vmem:[#allocation8 + $0x80] sm:$0xff] }
 0x402   :  { %v799_v32 = vrot.slane %v797_v28, 7  ;;  %v806_v37 = vmul.f32 %v805_v33, %v772_v57  ;;  %v154_v57 = vld [vmem:[#allocation8 + $0xc8] sm:$0xff] }
 0x403   :  { %v1753_v58 = vpack.c.bf16 %v154_v57, %v153_v56 }
 0x404   :  { %v801_v36 = vsub.f32 %v2219_v26, %v799_v32 }
 0x406   :  { %v810_v38 = vrot.slane %v801_v36, %v165_v34  ;;  %v146_v34 = vld [vmem:[#allocation8 + $0x88] sm:$0xff] }
 0x407   :  { %v1741_v47 = vpack.c.bf16 %v146_v34, %v145_v23 }
 0x408   :  { %v811_v39 = vadd.f32 %v810_v38, %v806_v37 }
 0x409   :  { %1742 = vmatpush3.bf16.msra.mxu0 %v1741_v47 }
 0x40a   :  { %v813_v40 = vmul.f32 0.70710677, %v811_v39  ;;  %v812_v42 = vmul.f32 0.5, %v811_v39  ;;  %1743 = vmatprep.subr.bf16.mxu0 %v2007_v1 }
 0x40c   :  { %1824 = verf.f32 %v813_v40 }
 0x40d   :  { %1745 = vmatpush3.bf16.msra.mxu0 %v1744_v50 }
 0x40e   :  { %1746 = vmatprep.subr.bf16.mxu0 %v2007_v1 }
 0x411   :  { %1748 = vmatpush3.bf16.msra.mxu0 %v1747_v53 }
 0x412   :  { %1749 = vmatprep.subr.bf16.mxu0 %v2007_v1 }
 0x416   :  { %v1825_v41 = vpop.eup %1824 }
 0x417   :  { %v815_v43 = vadd.f32 1.0, %v1825_v41 }
 0x419   :  { %v816_v44 = vmul.f32 %v815_v43, %v812_v42 }
 0x41b   :  { %v2335_v45 = vmul.f32 0.7072136, %v816_v44 }
 0x41d   :  { %1595 = vmatmul.mubr.f32.vlgmr.msra.gmra.mrb[6].mxu1 %v2335_v45 }
 0x41e   :  { %1638 = vmatpush3.msra.mxu1 %v1211_v46  ;;  %1639 = vmatprep.mubr.msk.f32.mxu1 %vm2008_vm0, %v2009_v2 }
 0x41f   :  { %1764 = vmatprep.subr.bf16.mxu1 %v2007_v1 }
 0x421   :  { %1640 = vmatmul.mubr.msk.f32.vlgmr.msra.gmra.mrb[8].mxu1 %vm328_vm2, %v2205_v19  ;;  %v151_v19 = vld [vmem:[#allocation8 + $0xb0] sm:$0xff] }
 0x422   :  { %1674 = vmatprep.mubr.msk.f32.mxu1 %vm2008_vm0, %v2009_v2  ;;  %v1750_v2 = vpack.c.bf16 %v152_v54, %v151_v19 }
 0x424   :  { %1751 = vmatpush3.bf16.msra.mxu0 %v1750_v2 }
 0x425   :  { %1752 = vmatprep.subr.bf16.mxu0 %v2007_v1 }
 0x428   :  { %1754 = vmatpush3.bf16.msra.mxu0 %v1753_v58 }
 0x429   :  { %1755 = vmatprep.subr.bf16.mxu0 %v2007_v1 }
 0x42c   :  { %1757 = vmatpush3.bf16.msra.mxu0 %v1756_v61 }
 0x42d   :  { %1758 = vmatprep.subr.bf16.mxu0 %v2007_v1 }
 0x430   :  { %1760 = vmatpush3.bf16.msra.mxu0 %v1759_v4  ;;  %v1771_v4 = vpack.c.bf16 %v1200_v0, %v1199_v62 }
 0x431   :  { %1761 = vmatprep.subr.bf16.mxu0 %v2007_v1 }
 0x434   :  { %1763 = vmatpush3.bf16.msra.mxu0 %v1762_v9  ;;  %v1774_v9 = vpack.c.bf16 %v1202_v8, %v1201_v7 }
 0x4f0   :  { %v954_v3 = vpop.f32.mrb[6].mxu1 }
 0x4f1   :  { %v955_v13 = vadd.f32 %v954_v3, %v2293_v55  ;;  %v1596_v14 = vpop.f32.mrb[7].mxu1  ;;  %v1204_v3 = vld [vmem:[%s2457_s7 + $0x48] sm:$0xff] }
 0x4f2   :  { %v1206_v14 = vld [vmem:[%s2457_s7 + $0x58] sm:$0xff] }
 0x4f3   :  { %v963_v15 = vadd.f32 %v962_v11, %v955_v13  ;;  %v1777_v11 = vpack.c.bf16 %v1204_v3, %v1203_v10  ;;  %v1205_v13 = vld [vmem:[%s2457_s7 + $0x50] sm:$0xff] }
 0x4f4   :  { %v2357_v16 = vpop.f32.mrb[8].mxu1 }
 0x4f5   :  { %v964_v30 = vrot.slane %v963_v15, 4  ;;  %v970_v17 = vmul.f32 %v963_v15, %v963_v15  ;;  %v1641_v18 = vpop.f32.mrb[9].mxu1 }
 0x4f7   :  { %v965_v20 = vadd.f32 %v964_v30, %v963_v15  ;;  %v971_v21 = vrot.slane %v970_v17, 4  ;;  %v1207_v30 = vld [vmem:[%s2457_s7 + $0x60] sm:$0xff] }
 0x4f9   :  { %v966_v27 = vrot.slane %v965_v20, 2  ;;  %v972_v28 = vadd.f32 %v971_v21, %v970_v17  ;;  %v1208_v17 = vld [vmem:[%s2457_s7 + $0x68] sm:$0xff]  ;;  %v1210_v21 = vld [vmem:[%s2457_s7 + $0x78] sm:$0xff] }
 0x4fa   :  { %v1783_v18 = vpack.c.bf16 %v1208_v17, %v1207_v30 }
 0x4fb   :  { %v967_v32 = vadd.f32 %v966_v27, %v965_v20  ;;  %v973_v33 = vrot.slane %v972_v28, 2  ;;  %v1209_v20 = vld [vmem:[%s2457_s7 + $0x70] sm:$0xff] }
 0x4fc   :  { %v1786_v27 = vpack.c.bf16 %v1210_v21, %v1209_v20 }
 0x4fd   :  { %v968_v36 = vrot.slane %v967_v32, 1  ;;  %v974_v24 = vadd.f32 %v973_v33, %v972_v28  ;;  %v1149_v28 = vsub.s32 7, %v2212_v22 }
 0x4ff   :  { %v969_v37 = vadd.f32 %v968_v36, %v967_v32  ;;  %v975_v38 = vrot.slane %v974_v24, 1  ;;  %v1150_v32 = vrot.slane %v2217_v25, %v1149_v28  ;;  %v1361_v8 = vrot.slane %v2219_v26, %v1149_v28 }
 0x501   :  { %v976_v39 = vadd.f32 %v975_v38, %v974_v24  ;;  %v977_v40 = vmul.f32 0.125, %v969_v37  ;;  %v1151_v36 = vmul.f32 %v1150_v32, %v2227_v29 }
 0x503   :  { %v978_v55 = vmul.f32 0.125, %v976_v39  ;;  %v979_v41 = vmul.f32 %v977_v40, %v977_v40 }
 0x505   :  { %v980_v42 = vsub.f32 %v978_v55, %v979_v41 }
 0x507   :  { %v981_v43 = vmax.f32 %v980_v42, 0.0 }
 0x509   :  { %v982_v44 = vadd.f32 1e-05, %v981_v43 }
 0x50b   :  { %1826 = vrsqrt.f32 %v982_v44 }
 0x515   :  { %v1827_v46 = vpop.eup %1826 }
 0x516   :  { %v984_v23 = vmul.f32 %v1827_v46, %v2219_v26 }
 0x518   :  { %v985_v34 = vmul.f32 %v984_v23, %v977_v40  ;;  %v993_v48 = vrot.slane %v984_v23, %v246_v12  ;;  %v1195_v12 = vld [vmem:[%s2457_s7] sm:$0xff] }
 0x51a   :  { %v987_v47 = vrot.slane %v985_v34, 7  ;;  %v994_v50 = vmul.f32 %v993_v48, %v963_v15  ;;  %v1780_v15 = vpack.c.bf16 %v1206_v14, %v1205_v13 }
 0x51c   :  { %v989_v49 = vsub.f32 %v2219_v26, %v987_v47 }
 0x51e   :  { %v998_v51 = vrot.slane %v989_v49, %v324_v35  ;;  %v1196_v35 = vld [vmem:[%s2457_s7 + $0x8] sm:$0xff] }
 0x51f   :  { %v1765_v59 = vpack.c.bf16 %v1196_v35, %v1195_v12 }
 0x520   :  { %v999_v52 = vadd.f32 %v998_v51, %v994_v50 }
 0x521   :  { %1766 = vmatpush3.bf16.msra.mxu1 %v1765_v59 }
 0x522   :  { %v1001_v53 = vmul.f32 0.70710677, %v999_v52  ;;  %v1000_v54 = vmul.f32 0.5, %v999_v52  ;;  %1767 = vmatprep.subr.bf16.mxu1 %v2007_v1 }
 0x524   :  { %1828 = verf.f32 %v1001_v53 }
 0x52e   :  { %v1829_v19 = vpop.eup %1828 }
 0x52f   :  { %v1003_v2 = vadd.f32 1.0, %v1829_v19 }
 0x531   :  { %v1004_v56 = vmul.f32 %v1003_v2, %v1000_v54 }
 0x533   :  { %v1005_v57 = vadd.f32 %v1004_v56, %v2335_v45  ;;  %v1197_v45 = vld [vmem:[%s2457_s7 + $0x10] sm:$0xff]  ;;  %s2020_s7 = smov [#allocation13]  }
 0x534   :  { %v1768_v61 = vpack.c.bf16 %v1198_v60, %v1197_v45  ;;  %s1370_s21 = sshll.u32 %s2020_s7, 4  ;;  %s1371_s21 = int_to_ptr.vmem [resolvable:$true] %s1370_s21 }
 0x535   :  { %v2366_v58 = vmul.f32 0.7072136, %v1005_v57  ;;  %s1966_s22 = scalar_lea.vmem %s1371_s21, 128  ;;  %p1971_p7 = scmp.lt.s32.totalorder %s1371_s21, %s1371_s21 }
 0x536   :  { %1769 = vmatpush3.bf16.msra.mxu1 %v1768_v61  ;;  %p1967_p6 = scmp.ne.s32.totalorder %s1371_s21, %s1966_s22  ;;  %p1972_p8 = scmp.lt.s32.totalorder %s1966_s22, %s1966_s22 }
 0x537   :  { %1635 = vmatmul.mubr.f32.vlgmr.msra.gmra.mrb[10].mxu0 %v2366_v58  ;;  %1770 = vmatprep.subr.bf16.mxu1 %v2007_v1 }
 0x538   :  { %p1973_p9 = por %p1972_p8, %p1971_p7 }
 0x53a   :  { %1772 = vmatpush3.bf16.msra.mxu1 %v1771_v4  ;;  %p1974_p10 = pnand %p1973_p9, %p1967_p6 }
 0x53b   :  { %1773 = vmatprep.subr.bf16.mxu1 %v2007_v1 }
 0x53e   :  { %1775 = vmatpush3.bf16.msra.mxu1 %v1774_v9 }
 0x53f   :  { %1776 = vmatprep.subr.bf16.mxu1 %v2007_v1 }
 0x542   :  { %1778 = vmatpush3.bf16.msra.mxu1 %v1777_v11 }
 0x543   :  { %1779 = vmatprep.subr.bf16.mxu1 %v2007_v1 }
 0x546   :  { %1781 = vmatpush3.bf16.msra.mxu1 %v1780_v15 }
 0x547   :  { %1782 = vmatprep.subr.bf16.mxu1 %v2007_v1 }
 0x54a   :  { %1784 = vmatpush3.bf16.msra.mxu1 %v1783_v18 }
 0x54b   :  { %1785 = vmatprep.subr.bf16.mxu1 %v2007_v1 }
 0x54e   :  { %1787 = vmatpush3.bf16.msra.mxu1 %v1786_v27 }
 0x60a   :  { %v1143_v33 = vpop.f32.mrb[10].mxu0 }
 0x60b   :  { %v1144_v24 = vadd.f32 %v1143_v33, %v2327_v63  ;;  %v1636_v37 = vpop.f32.mrb[11].mxu0 }
 0x60d   :  { %v1152_v38 = vadd.f32 %v1151_v36, %v1144_v24 }
 0x60f   :  { %v1153_v39 = vrot.slane %v1152_v38, 4  ;;  %v1159_v40 = vmul.f32 %v1152_v38, %v1152_v38 }
 0x611   :  { %v1154_v55 = vadd.f32 %v1153_v39, %v1152_v38  ;;  %v1160_v41 = vrot.slane %v1159_v40, 4 }
 0x613   :  { %v1155_v42 = vrot.slane %v1154_v55, 2  ;;  %v1161_v43 = vadd.f32 %v1160_v41, %v1159_v40 }
 0x615   :  { %v1156_v44 = vadd.f32 %v1155_v42, %v1154_v55  ;;  %v1162_v1 = vrot.slane %v1161_v43, 2 }
 0x617   :  { %v1157_v46 = vrot.slane %v1156_v44, 1  ;;  %v1163_v23 = vadd.f32 %v1162_v1, %v1161_v43 }
 0x619   :  { %v1158_v34 = vadd.f32 %v1157_v46, %v1156_v44  ;;  %v1164_v47 = vrot.slane %v1163_v23, 1 }
 0x61b   :  { %v1165_v25 = vadd.f32 %v1164_v47, %v1163_v23  ;;  %v1166_v48 = vmul.f32 0.125, %v1158_v34 }
 0x61d   :  { %v1167_v49 = vmul.f32 0.125, %v1165_v25  ;;  %v1168_v29 = vmul.f32 %v1166_v48, %v1166_v48 }
 0x61f   :  { %v1169_v50 = vsub.f32 %v1167_v49, %v1168_v29 }
 0x621   :  { %v1170_v63 = vmax.f32 %v1169_v50, 0.0 }
 0x623   :  { %v1171_v51 = vadd.f32 1e-05, %v1170_v63 }
 0x625   :  { %1830 = vrsqrt.f32 %v1171_v51 }
 0x62f   :  { %v1831_v52 = vpop.eup %1830 }
 0x630   :  { %v1173_v53 = vmul.f32 %v1831_v52, %v2219_v26 }
 0x632   :  { %v1174_v19 = vmul.f32 %v1173_v53, %v1166_v48  ;;  %v1182_v2 = vrot.slane %v1173_v53, %v406_v5 }
 0x634   :  { %v1176_v54 = vrot.slane %v1174_v19, 7  ;;  %v1183_v57 = vmul.f32 %v1182_v2, %v1152_v38 }
 0x636   :  { %v1178_v56 = vsub.f32 %v2219_v26, %v1176_v54 }
 0x638   :  { %v1187_v12 = vrot.slane %v1178_v56, %v596_v6 }
 0x63a   :  { %v1188_v35 = vadd.f32 %v1187_v12, %v1183_v57 }
 0x63c   :  { %v1190_v59 = vmul.f32 0.70710677, %v1188_v35  ;;  %v1189_v60 = vmul.f32 0.5, %v1188_v35 }
 0x63e   :  { %1832 = verf.f32 %v1190_v59 }
 0x648   :  { %v1833_v45 = vpop.eup %1832 }
 0x649   :  { %v1192_v61 = vadd.f32 1.0, %v1833_v45 }
 0x64b   :  { %v1193_v62 = vmul.f32 %v1192_v61, %v1189_v60 }
 0x64d   :  { %v1194_v0 = vadd.f32 %v1193_v62, %v2366_v58 }
 0x64f   :  { %1675 = vmatmul.mubr.f32.vlgmr.msra.gmra.mrb[10].mxu1 %v1194_v0 }
 0x722   :  { %v1348_v4 = vpop.f32.mrb[10].mxu1 }
 0x723   :  { %v1349_v7 = vadd.f32 %v1348_v4, %v2357_v16  ;;  %v1676_v5 = vpop.f32.mrb[11].mxu1 }
 0x725   :  { %v1357_v22 = vadd.f32 %v2233_v31, %v1349_v7 }
 0x727   :  { %v1362_v6 = vadd.f32 %v1361_v8, %v1357_v22 }
 0x729   :  { %1363 = vst [vmem:[#allocation13] sm:$0xff] %v1362_v6 }
 0x72a   :  { %1977 = shalt.err (!%p1974_p10)
}
 0x72b   :  { %s1978_s25 = scalar_lea.hbm %s2459_s9, 128 }
 0x72c   :  { %p1979_p11 = scmp.ne.s32.totalorder %s2459_s9, %s1978_s25  ;;  %p1982_p12 = scmp.lt.u32.totalorder %s1978_s25, %s2459_s9 }
 0x72e   :  { %p1984_p13 = pnand %p1982_p12, %p1979_p11 }
 0x730   :  { %1987 = shalt.err (!%p1984_p13)
}
 0x731   :  { %1373 = dma.vmem_to_hbm [thread:$0]  %s1371_s21, 128, %s2459_s9, [#allocation4]  }
 0x732   :  { %1996 = dma.done.wait [#allocation4], 128  }
 0x733   :  { %1997 = vsyncadd [#allocation4], 4294967168 }
 0x734   :  { %1377 = vsyncpa [#allocation3], 1 }
 0x735   :  { %1378 = vsyncpa [#allocation6], 1 }
 0x736   :  { %1379 = vsyncpa [#allocation9], 1 }
 0x737   :  { %1380 = vsyncpa [#allocation12], 1 }
 0x738   :  { %1381 = vsyncpa [#allocation4], 1 }

</bundles_post_ra>
